<compile_context>
chip_gen: v7x
topology: tpu7x:2x2x1
jax: 0.10.0
libtpu: 0.0.40
codegen_flags: <defaults>
</compile_context>

<pallas_src>
import jax
import jax.numpy as jnp
from jax import lax
from jax.experimental import pallas as pl
from jax.experimental.pallas import tpu as pltpu

_LANES = 128
_ROW_ALIGN = 32                         # sublane multiple safe for f32/bf16/int8/fp8 tiles
_TILE_BYTE_BUDGET = 2 * 1024 * 1024     # target bytes per input stream per pipeline buffer
_TOTAL_INPUT_VMEM_BUDGET = 32 * 1024 * 1024   # cap for 2K streams x 2 buffers x tile bytes
_SMALL_FALLBACK_BYTES = 1024 * 1024     # below this, plain jnp beats Pallas dispatch
_VMEM_LIMIT_CAP = 48 * 1024 * 1024      # stay well under v7x's 64 MiB/TC physical VMEM


def _cdiv(a, b):
    return -(-a // b)


def _round_up(a, m):
    return _cdiv(a, m) * m


# ----------------------------------------------------------------------------
# Fused tiled reduction kernel (the hot path)
# ----------------------------------------------------------------------------
def _make_fused_kernel(kinds, tile_rows, rows_total, needs_mask):
    """Kernel computing per-tile partial sums for K (x, y) pairs.

    kinds[t] == "sq"  -> partial sum of (x - y)^2   (MSE numerator)
    kinds[t] == "abs" -> partial sum of |x - y|     (L1 numerator)

    Inputs : 2*K refs of shape (tile_rows, 128) (original dtypes, upcast on VPU).
    Output : 1 ref of shape (1, 1, K*128) — one unmasked lane-dense store of the
             per-tile partials (sublane reduce only; the tiny cross-lane /
             cross-tile reduce happens in the wrapper).
    Rows beyond `rows_total` in the (possibly partial) last tile are masked
    in-kernel, so the wrapper never pads slabs up to a tile boundary.
    """
    k = len(kinds)

    def kernel(*refs):
        o_ref = refs[-1]
        if needs_mask:
            i = pl.program_id(0)
            row_ids = lax.broadcasted_iota(jnp.int32, (tile_rows, _LANES), 0)
            limit = rows_total - i * tile_rows          # all-true for non-last tiles
            mask = row_ids < limit
        parts = []
        for t in range(k):
            x = refs[2 * t][...].astype(jnp.float32)
            y = refs[2 * t + 1][...].astype(jnp.float32)
            d = x - y
            contrib = d * d if kinds[t] == "sq" else jnp.abs(d)
            if needs_mask:
                contrib = jnp.where(mask, contrib, 0.0)  # garbage OOB rows -> 0
            parts.append(jnp.sum(contrib, axis=0, keepdims=True))   # (1, 128)
        # Single unmasked K*128-lane store.
        o_ref[...] = jnp.concatenate(parts, axis=-1).reshape(1, 1, k * _LANES)

    return kernel


def _to_slab(a):
    """Flatten `a` row-major to a lane-dense (rows, 128) slab.

    Padding happens ONLY when the flat size is not a multiple of 128 (at most
    127 trailing zeros, which contribute 0 to both squared and absolute diffs).
    """
    flat = jnp.ravel(a)
    n = int(flat.shape[0])
    rows = _cdiv(n, _LANES)
    total = rows * _LANES
    if total != n:
        # TODO(synk): this ragged-by-<128 tail still costs one fused pad/copy
        # pass on this stream; tile-boundary / cross-pair padding is gone
        # (handled by in-kernel row masking + per-size-class grouping).
        flat = jnp.pad(flat, (0, total - n))
    return flat.reshape(rows, _LANES), rows


def _pallas_group_reduce(kinds, pairs):
    """Fused mean-reductions for pairs that share the same flattened row count.

    Returns a list of f32 scalar means, one per pair.
    """
    k = len(pairs)
    assert len(kinds) == k and k >= 1

    slabs, sizes = [], []
    rows = None
    max_item = 1
    for x, y in pairs:
        assert x.shape == y.shape, f"pred/gt shape mismatch: {x.shape} vs {y.shape}"
        sizes.append(int(x.size))
        sx, rx = _to_slab(x)
        sy, ry = _to_slab(y)
        assert rx == ry
        rows = rx if rows is None else rows
        assert rows == rx, "pairs in one group must share the same row count"
        slabs += [sx, sy]
        max_item = max(max_item, jnp.dtype(sx.dtype).itemsize,
                       jnp.dtype(sy.dtype).itemsize)

    # --- dtype-aware, byte-budget tile sizing -------------------------------
    per_stream_budget = min(_TILE_BYTE_BUDGET,
                            _TOTAL_INPUT_VMEM_BUDGET // (2 * 2 * k))
    budget_rows = max(_ROW_ALIGN,
                      (per_stream_budget // (_LANES * max_item)) // _ROW_ALIGN * _ROW_ALIGN)
    # Cap so num_tiles >= 2: lets the "parallel" grid split across v7x's 2 TCs.
    half_rows = _round_up(_cdiv(rows, 2), _ROW_ALIGN)
    tile_rows = max(_ROW_ALIGN, min(budget_rows, half_rows))
    num_tiles = _cdiv(rows, tile_rows)
    needs_mask = (num_tiles * tile_rows) != rows

    # --- scoped-VMEM limit from the real double-buffered footprint ----------
    dbl_buf_bytes = sum(2 * tile_rows * _LANES * jnp.dtype(s.dtype).itemsize
                        for s in slabs)
    out_buf_bytes = 2 * k * _LANES * 4
    vmem_limit = max(32 * 1024 * 1024, dbl_buf_bytes + out_buf_bytes + (4 << 20))
    vmem_limit = min(vmem_limit, _VMEM_LIMIT_CAP)

    in_bytes = sum(int(s.size) * jnp.dtype(s.dtype).itemsize for s in slabs)
    cost = pl.CostEstimate(flops=3 * sum(sizes), transcendentals=0,
                           bytes_accessed=in_bytes + num_tiles * k * _LANES * 4)

    in_spec = pl.BlockSpec((tile_rows, _LANES), lambda i: (i, 0))
    out = pl.pallas_call(
        _make_fused_kernel(tuple(kinds), tile_rows, rows, needs_mask),
        out_shape=jax.ShapeDtypeStruct((num_tiles, 1, k * _LANES), jnp.float32),
        grid=(num_tiles,),
        in_specs=[in_spec] * (2 * k),
        out_specs=pl.BlockSpec((1, 1, k * _LANES), lambda i: (i, 0, 0)),
        compiler_params=pltpu.CompilerParams(
            dimension_semantics=("parallel",),
            vmem_limit_bytes=int(vmem_limit),
        ),
        cost_estimate=cost,
    )(*slabs)

    # Tiny finalize in plain JAX: cross-tile + cross-lane sum, divide by TRUE count.
    totals = jnp.sum(out.reshape(num_tiles, k, _LANES), axis=(0, 2))   # (k,)
    return [totals[t] / sizes[t] for t in range(k)]


def _pair_reduce(kinds, pairs):
    """Dispatch: tiny pairs -> plain jnp; larger pairs grouped by row count -> fused Pallas."""
    results = [None] * len(pairs)
    groups = {}
    for idx, ((x, y), kind) in enumerate(zip(pairs, kinds)):
        assert x.shape == y.shape, f"pred/gt shape mismatch: {x.shape} vs {y.shape}"
        nbytes = int(x.size) * max(jnp.dtype(x.dtype).itemsize,
                                   jnp.dtype(y.dtype).itemsize)
        if nbytes < _SMALL_FALLBACK_BYTES:
            # Tiny tensor: XLA's fused sub/square/reduce beats a Pallas launch.
            xf = x.astype(jnp.float32)
            yf = y.astype(jnp.float32)
            d = xf - yf
            results[idx] = jnp.mean(d * d) if kind == "sq" else jnp.mean(jnp.abs(d))
        else:
            rows = _cdiv(int(x.size), _LANES)
            groups.setdefault(rows, []).append((idx, kind, x, y))
    for rows, members in groups.items():
        vals = _pallas_group_reduce([m[1] for m in members],
                                    [(m[2], m[3]) for m in members])
        for (idx, _, _, _), v in zip(members, vals):
            results[idx] = v
    return results


def pallas_mse(x, y):
    """Equivalent of nn.MSELoss() (mean reduction)."""
    return _pair_reduce(["sq"], [(x, y)])[0]


def pallas_l1(x, y):
    """Equivalent of nn.L1Loss() (mean reduction)."""
    return _pair_reduce(["abs"], [(x, y)])[0]


# Registry so the module can fuse all per-task losses into one pallas_call.
# NOTE: keyed by function identity — wrapping pallas_mse/pallas_l1 in a
# partial/lambda silently drops off the fused path (correct, just slower).
_LOSS_KIND = {pallas_mse: "sq", pallas_l1: "abs"}


# ----------------------------------------------------------------------------
# Tiny helpers (plain jnp on purpose — a few hundred elements each).
# ----------------------------------------------------------------------------
def _mse_small(a, b):
    a = jnp.asarray(a, jnp.float32)
    b = jnp.asarray(b, jnp.float32)
    return jnp.mean((a - b) ** 2)


def get_block_select_stats(Dbs):
    """Each Db: (B, Nb) soft block-keep gates."""
    num_activated = jnp.zeros((Dbs[0].shape[0],), jnp.float32)
    for db in Dbs:
        num_activated = num_activated + jnp.sum(
            db.astype(jnp.float32), axis=tuple(range(1, db.ndim)))
    num_total = sum(db.shape[1] for db in Dbs)
    return num_activated, num_total


def get_tokens_select_stats(DTs, weighted=False):
    """Each DT: (B, N, 1) soft token-keep decisions."""
    per_layer_counts = [jnp.sum(dt.astype(jnp.float32), axis=(1, 2)) for dt in DTs]
    num_activated = jnp.zeros_like(per_layer_counts[0])
    for c in per_layer_counts:
        num_activated = num_activated + c
    num_total = sum(dt.shape[1] for dt in DTs)
    per_layer = [per_layer_counts[l] / DTs[l].shape[1] for l in range(len(DTs))]
    return num_activated, num_total, per_layer


# ----------------------------------------------------------------------------
# The module
# ----------------------------------------------------------------------------
class MultiObjectiveMultiTaskLoss:
    def __init__(self, tasks, loss_ft, loss_weights, efficiency_weight=1.0,
                 tokens_efficiency_target=0.5, blocks_efficiency_target=0.9,
                 policy='single', ada_blocks=False, ada_tokens=False,
                 pertask_overlap_weight=0.0, per_layer_loss=False,
                 weighted_tokens=False, mixed_efficiency_loss=False,
                 is_kd=False, kd_weight=0.1):
        assert set(tasks) == set(loss_ft.keys())
        assert set(tasks) == set(loss_weights.keys())
        self.tasks = tasks
        self.loss_ft = loss_ft
        self.loss_weights = loss_weights
        self.efficiency_weight = efficiency_weight
        self.tokens_efficiency_target = tokens_efficiency_target
        self.blocks_efficiency_target = blocks_efficiency_target
        self.pertask_overlap_weight = pertask_overlap_weight
        self.weighted_tokens = weighted_tokens
        self.per_layer_loss = per_layer_loss
        self.mixed_efficiency_loss = mixed_efficiency_loss
        self.policy = policy
        self.ada_blocks = ada_blocks
        self.ada_tokens = ada_tokens
        self.is_kd = is_kd
        self.kd_weight = kd_weight
        self.efficiency_loss_fct = _mse_small   # nn.MSELoss() on tiny tensors

    def __call__(self, pred, gt, Dbs, DTs, DTs_pertask=None,
                 teacher_pred=None, task=None):
        ts = self.tasks if task is None else [task]

        # ---- per-task reconstruction losses -------------------------------
        kinds = [_LOSS_KIND.get(self.loss_ft[t]) for t in ts]
        if all(kd is not None for kd in kinds):
            # Fused path: per-task losses share pallas_calls grouped by size class.
            vals = _pair_reduce(kinds, [(pred[t], gt[t]) for t in ts])
            out = dict(zip(ts, vals))
        else:
            out = {t: self.loss_ft[t](pred[t], gt[t]) for t in ts}
        student_loss = jnp.sum(jnp.stack([self.loss_weights[t] * out[t] for t in ts]))
        out['total'] = student_loss

        # ---- decision-mask statistics (tiny; plain jnp) -------------------
        num_activated_blocks, num_total_blocks = get_block_select_stats(Dbs)

        if self.policy == 'single':
            num_activated_tokens, num_total_tokens, per_layer_tokens = \
                get_tokens_select_stats(DTs, weighted=self.weighted_tokens)
            per_layer_tokens = jnp.stack(per_layer_tokens).T       # stack + permute(1, 0)
        elif self.policy == 'per_task':
            # TODO(synk): per-task token-overlap branch not exercised in this synthetic config
            raise NotImplementedError("per_task policy not implemented in Pallas port")
        else:
            raise ValueError(f'{self.policy} is not a defined mode')

        percentage_activated_layers = num_activated_blocks / num_total_blocks
        percentage_activated_tokens = num_activated_tokens / num_total_tokens

        # ---- efficiency loss ----------------------------------------------
        efficiency_loss = jnp.float32(0.0)
        if self.ada_blocks:
            efficiency_loss = efficiency_loss + self.efficiency_loss_fct(
                percentage_activated_layers,
                self.blocks_efficiency_target * jnp.ones_like(percentage_activated_layers))
        if self.ada_tokens:
            if self.mixed_efficiency_loss:
                efficiency_loss = efficiency_loss + 0.5 * self.efficiency_loss_fct(
                    per_layer_tokens,
                    self.tokens_efficiency_target * jnp.ones_like(per_layer_tokens))
                efficiency_loss = efficiency_loss + 0.5 * self.efficiency_loss_fct(
                    percentage_activated_tokens,
                    self.tokens_efficiency_target * jnp.ones_like(percentage_activated_tokens))
            elif self.per_layer_loss:
                efficiency_loss = efficiency_loss + self.efficiency_loss_fct(
                    per_layer_tokens,
                    self.tokens_efficiency_target * jnp.ones_like(per_layer_tokens))
            else:
                efficiency_loss = efficiency_loss + self.efficiency_loss_fct(
                    percentage_activated_tokens,
                    self.tokens_efficiency_target * jnp.ones_like(percentage_activated_tokens))

        kd_loss = None
        if self.is_kd:
            # TODO(synk): KD path (nn.KLDivLoss over log_softmax/softmax) not implemented
            raise NotImplementedError("KD path not implemented in Pallas port")
        loss = student_loss + self.efficiency_weight * efficiency_loss
        return (loss, student_loss, self.efficiency_weight * efficiency_loss, out, kd_loss)


# ----------------------------------------------------------------------------
# Demo
# ----------------------------------------------------------------------------
if __name__ == "__main__":
    key = jax.random.PRNGKey(0)
    tasks = ["depth", "normals"]
    loss_ft = {"depth": pallas_mse, "normals": pallas_l1}
    loss_weights = {"depth": 1.0, "normals": 0.5}

    criterion = MultiObjectiveMultiTaskLoss(
        tasks, loss_ft, loss_weights,
        efficiency_weight=1.0,
        tokens_efficiency_target=0.5,
        blocks_efficiency_target=0.9,
        policy="single",
        ada_blocks=True,
        ada_tokens=True,
    )

    n_layers, n_tokens = 4, 64
    keys = jax.random.split(key, 10)
    DTs = [jax.nn.sigmoid(jax.random.normal(k, (2, n_tokens, 1), jnp.float32))
           for k in jax.random.split(keys[8], n_layers)]
    Dbs = [jax.nn.sigmoid(jax.random.normal(k, (2, 1), jnp.float32))
           for k in jax.random.split(keys[9], n_layers)]

    def _close(a, b, rtol=1e-3):
        a, b = float(a), float(b)
        return abs(a - b) <= rtol * max(1.0, abs(b))

    # --- 1) small shapes: full module semantics (tiny-tensor jnp fallback) ---
    B, C, H, W = 2, 4, 16, 16
    pred_s = {"depth": jax.random.normal(keys[0], (B, C, H, W), jnp.float32),
              "normals": jax.random.normal(keys[1], (B, C, H, W), jnp.float32)}
    gt_s = {"depth": jax.random.normal(keys[2], (B, C, H, W), jnp.float32),
            "normals": jax.random.normal(keys[3], (B, C, H, W), jnp.float32)}
    loss_s, student_s, eff_s, out_s, _ = criterion(pred_s, gt_s, Dbs, DTs)
    jax.block_until_ready(loss_s)
    assert _close(out_s["depth"], jnp.mean((pred_s["depth"] - gt_s["depth"]) ** 2))
    assert _close(out_s["normals"], jnp.mean(jnp.abs(pred_s["normals"] - gt_s["normals"])))

    # --- 2) medium shapes: fused, tiled, pipelined Pallas hot path (K=2) -----
    Hm, Wm = 256, 160   # 2*4*256*160 = 327,680 elems = 1.25 MiB f32 per tensor
    pred_m = {"depth": jax.random.normal(keys[0], (B, C, Hm, Wm), jnp.float32),
              "normals": jax.random.normal(keys[1], (B, C, Hm, Wm), jnp.float32)}
    gt_m = {"depth": jax.random.normal(keys[2], (B, C, Hm, Wm), jnp.float32),
            "normals": jax.random.normal(keys[3], (B, C, Hm, Wm), jnp.float32)}
    loss_m, student_m, eff_m, out_m, _ = criterion(pred_m, gt_m, Dbs, DTs)
    jax.block_until_ready(loss_m)
    assert _close(out_m["depth"], jnp.mean((pred_m["depth"] - gt_m["depth"]) ** 2))
    assert _close(out_m["normals"], jnp.mean(jnp.abs(pred_m["normals"] - gt_m["normals"])))

    # --- 3) ragged size: exercises the in-kernel last-tile row masking path ---
    xr = jax.random.normal(keys[4], (3, 5, 133, 135), jnp.float32)
    yr = jax.random.normal(keys[5], (3, 5, 133, 135), jnp.float32)
    mse_r = pallas_mse(xr, yr)
    jax.block_until_ready(mse_r)
    assert _close(mse_r, jnp.mean((xr - yr) ** 2))

    # --- 4) bf16 inputs: dtype-aware slabs (bf16 DMA, f32 upcast in-kernel) ---
    xb = jax.random.normal(keys[6], (2, 4, 512, 128), jnp.bfloat16)
    yb = jax.random.normal(keys[7], (2, 4, 512, 128), jnp.bfloat16)
    l1_b = pallas_l1(xb, yb)
    jax.block_until_ready(l1_b)
    ref_b = jnp.mean(jnp.abs(xb.astype(jnp.float32) - yb.astype(jnp.float32)))
    assert _close(l1_b, ref_b)

    print("KERNEL_OK")
</pallas_src>

<mosaic_0001>
module attributes {stable_mosaic.version = 11 : i64} {
  func.func @kernel(%arg0: i32, %arg1: memref<1280x128xf32, #tpu.memory_space<vmem>>, %arg2: memref<1280x128xf32, #tpu.memory_space<vmem>>, %arg3: memref<1280x128xf32, #tpu.memory_space<vmem>>, %arg4: memref<1280x128xf32, #tpu.memory_space<vmem>>, %arg5: memref<1x1x256xf32, #tpu.memory_space<vmem>>) attributes {dimension_semantics = [#tpu.dimension_semantics<parallel>], iteration_bounds = array<i64: 2>, scalar_prefetch = 0 : i64, scratch_operands = 0 : i64, tpu.core_type = #tpu.core_type<tc>, window_params = [{transform_indices = @transform_0, window_bounds = array<i64: 1280, 128>}, {transform_indices = @transform_1, window_bounds = array<i64: 1280, 128>}, {transform_indices = @transform_2, window_bounds = array<i64: 1280, 128>}, {transform_indices = @transform_3, window_bounds = array<i64: 1280, 128>}, {transform_indices = @transform_4, window_bounds = array<i64: 1, 1, 256>}]} {
    %c0 = arith.constant 0 : index
    %c0_0 = arith.constant 0 : index
    %0 = vector.load %arg1[%c0, %c0_0] : memref<1280x128xf32, #tpu.memory_space<vmem>>, vector<1280x128xf32>
    %c0_1 = arith.constant 0 : index
    %c0_2 = arith.constant 0 : index
    %1 = vector.load %arg2[%c0_1, %c0_2] : memref<1280x128xf32, #tpu.memory_space<vmem>>, vector<1280x128xf32>
    %2 = arith.subf %0, %1 : vector<1280x128xf32>
    %3 = arith.mulf %2, %2 : vector<1280x128xf32>
    %cst = arith.constant dense<0.000000e+00> : vector<128xf32>
    %4 = vector.multi_reduction <add>, %3, %cst [0] : vector<1280x128xf32> to vector<128xf32>
    %5 = vector.shape_cast %4 : vector<128xf32> to vector<1x128xf32>
    %c0_3 = arith.constant 0 : index
    %c0_4 = arith.constant 0 : index
    %6 = vector.load %arg3[%c0_3, %c0_4] : memref<1280x128xf32, #tpu.memory_space<vmem>>, vector<1280x128xf32>
    %c0_5 = arith.constant 0 : index
    %c0_6 = arith.constant 0 : index
    %7 = vector.load %arg4[%c0_5, %c0_6] : memref<1280x128xf32, #tpu.memory_space<vmem>>, vector<1280x128xf32>
    %8 = arith.subf %6, %7 : vector<1280x128xf32>
    %9 = math.absf %8 : vector<1280x128xf32>
    %cst_7 = arith.constant dense<0.000000e+00> : vector<128xf32>
    %10 = vector.multi_reduction <add>, %9, %cst_7 [0] : vector<1280x128xf32> to vector<128xf32>
    %11 = vector.shape_cast %10 : vector<128xf32> to vector<1x128xf32>
    %12 = tpu.concatenate %5, %11 in 1 : vector<1x128xf32>, vector<1x128xf32> -> vector<1x256xf32>
    %13 = vector.shape_cast %12 : vector<1x256xf32> to vector<1x1x256xf32>
    %c0_8 = arith.constant 0 : index
    %c0_9 = arith.constant 0 : index
    %c0_10 = arith.constant 0 : index
    %14 = vector.load %arg5[%c0_8, %c0_9, %c0_10] : memref<1x1x256xf32, #tpu.memory_space<vmem>>, vector<1x1x256xf32>
    tpu.vector_store %arg5[%c0_8, %c0_9, %c0_10], %13 {strides = array<i32>} : memref<1x1x256xf32, #tpu.memory_space<vmem>>, vector<1x1x256xf32>,
    return
  }
  func.func @transform_0(%arg0: i32) -> (i32, i32) {
    %c0_i32 = arith.constant 0 : i32
    %c0_i32_0 = arith.constant 0 : i32
    return %arg0, %c0_i32 : i32, i32
  }
  func.func @transform_1(%arg0: i32) -> (i32, i32) {
    %c0_i32 = arith.constant 0 : i32
    %c0_i32_0 = arith.constant 0 : i32
    return %arg0, %c0_i32 : i32, i32
  }
  func.func @transform_2(%arg0: i32) -> (i32, i32) {
    %c0_i32 = arith.constant 0 : i32
    %c0_i32_0 = arith.constant 0 : i32
    return %arg0, %c0_i32 : i32, i32
  }
  func.func @transform_3(%arg0: i32) -> (i32, i32) {
    %c0_i32 = arith.constant 0 : i32
    %c0_i32_0 = arith.constant 0 : i32
    return %arg0, %c0_i32 : i32, i32
  }
  func.func @transform_4(%arg0: i32) -> (i32, i32, i32) {
    %c0_i32 = arith.constant 0 : i32
    %c0_i32_0 = arith.constant 0 : i32
    %c0_i32_1 = arith.constant 0 : i32
    return %arg0, %c0_i32, %c0_i32_0 : i32, i32, i32
  }
}

</mosaic_0001>

<bundles_post_ra>
// kernel: tpu_custom_call.1
= control target key start
LH: loop header
LB: loop body
LE: loop exit
PB: predicated region body
PF: predicated region fallthrough
CT: control target
= control target key end

     0   :  { %s3380_s0 = inlined_call_operand.hbm [shape: f32[2560,128], index: 0, kind: input, shape index: {}]   ;;  %s3381_s1 = inlined_call_operand.hbm [shape: f32[2560,128], index: 1, kind: input, shape index: {}]   ;;  %s3382_s2 = inlined_call_operand.hbm [shape: f32[2560,128], index: 2, kind: input, shape index: {}]   ;;  %s3383_s3 = inlined_call_operand.hbm [shape: f32[2560,128], index: 3, kind: input, shape index: {}]   ;;  %s3384_s4 = inlined_call_operand.hbm [shape: f32[2,1,256], index: 4, kind: output, shape index: {}]  }
   0x1   :  { %3391 = sst [smem:[#allocation16_spill]] %s3380_s0 }
   0x2   :  { %3392 = sst [smem:[#allocation17_spill]] %s3381_s1 }
   0x3   :  { %9 = vsyncpa [#allocation3], 0 }
   0x4   :  { %11 = vsyncpa [#allocation3 + $0x1], 0 }
   0x5   :  { %12 = vsyncpa [#allocation6], 0 }
   0x6   :  { %14 = vsyncpa [#allocation6 + $0x1], 0 }
   0x7   :  { %15 = vsyncpa [#allocation9], 0 }
   0x8   :  { %17 = vsyncpa [#allocation9 + $0x1], 0 }
   0x9   :  { %18 = vsyncpa [#allocation4], 0 }
   0xa   :  { %20 = vsyncpa [#allocation4 + $0x1], 0  ;;  %s2438_s15 = smov 0   ;;  %s2440_s16 = smov 0  }
   0xb   :  { %s2442_s17 = smov 0   ;;  %s2444_s18 = smov 0  }
   0xc LB: > { %s2459_s19 = sadd.s32 4294967295, %s2403_s18   ;;  %s2121_s20 = sadd.s32 4294967294, %s2403_s18   ;;  %s2403_s18 = sphi %s2444_s18, %s3414_s18   ;;  %s2399_s17 = sphi %s2442_s17, %s3413_s17   ;;  %s2395_s16 = sphi %s2440_s16, %s3412_s16   ;;  %s2391_s15 = sphi %s2438_s15, %s3411_s15  }
   0xd   : > { %s2463_s21 = sadd.s32 1, %s2403_s18   ;;  %s33_s22 = sadd.s32 1, %s2399_s17 }
   0xe   : > { %s30_s23 = ssub.s32 %s2403_s18, %s2463_s21  ;;  %p40_p0 = scmp.ne.s32.totalorder %s2399_s17, %s2395_s16 }
   0xf   : > { %p31_p1 = scmp.eq.s32.totalorder %s30_s23, 0  ;;  %p41_p2 = scmp.eq.s32.totalorder %s2403_s18, 0 }
  0x10   : > { %p46_p3 = scmp.ne.s32.totalorder %s2395_s16, %s2391_s15  ;;  %p47_p4 = scmp.eq.s32.totalorder %s2459_s19, 0 }
  0x11   : > { %s2475_s24 = scalar_select %p31_p1, %s2399_s17, %s33_s22  }
  0x12   : > { %p42_p5 = por %p41_p2, %p40_p0  ;;  %p2477_p6 = por %p47_p4, %p46_p3 }
  0x13   : > { %3393 = sst [smem:[#allocation15_spill]] %s2475_s24  ;;  %p148_p7 = scmp.eq.s32.totalorder %s2459_s19, 1 }
  0x14   : > { %s3394_s25 = scalar_select %p2477_p6, 1, 0 }
  0x15   : > { %p154_p8 = scmp.eq.s32.totalorder %s2121_s20, 1  ;;  %p2172_p10 = scmp.lt.s32.totalorder %s2403_s18, 2 }
  0x16   : > { %p2484_p11 = por %p148_p7, %p40_p0  ;;  %s2493_s28 = sand.u32 1, %s2399_s17  }
  0x17   : > { %p2488_p12 = por %p154_p8, %p46_p3  ;;  %s2496_s29 = smul.u32 20480, %s2403_s18 }
  0x18   : > { %s3395_s26 = scalar_select %p2484_p11, 1, 0 }
  0x19   : > { %s3396_s27 = scalar_select %p2488_p12, 1, 0 }
  0x1a   : > { %s2499_s30 = smul.u32 1280, %s2493_s28  ;;  %p2501_p13 = pnand %p2172_p10, %p42_p5 }
  0x1b   : > { %s195_s6 = sand.u32 1, %s2403_s18   ;;  %s3398_s1 = sld [smem:[#allocation17_spill]] }
  0x1c   : > { %s199_s10 = scalar_lea.vmem [#allocation5], %s2499_s30  ;;  %s2516_s12 = scalar_lea.sflag [#allocation6], %s195_s6 }
  0x1d   : > { %s206_s11 = sshll.u32 %s199_s10, 4  ;;  %p2522_p2 = pneg %p2501_p13  ;;  %s2513_s11 = int_to_ptr.vmem [resolvable:$true] %s206_s11 }
  0x21   : > { %s2510_s9 = scalar_lea.hbm %s3398_s1, %s2496_s29  ;;  %s2214_s23 = scalar_lea.hbm %s3398_s1, 40960 }
  0x22   : > { %s2209_s13 = scalar_lea.hbm %s2510_s9, 20480  ;;  %p2215_p5 = scmp.lt.u32.totalorder %s2510_s9, %s3398_s1 }
  0x23   : > { %p2210_p1 = scmp.ne.s32.totalorder %s2510_s9, %s2209_s13  ;;  %p2216_p7 = scmp.lt.u32.totalorder %s2214_s23, %s2209_s13 }
  0x24   : > { %p2218_p10 = scmp.lt.u32.totalorder %s2209_s13, %s2510_s9 }
  0x25   : > { %p2212_p3 = pnand %p2522_p2, %p2210_p1  ;;  %p2217_p8 = por %p2216_p7, %p2215_p5 }
  0x27   : > { %p2213_p4 = pneg %p2212_p3  ;;  %p2219_p9 = por %p2218_p10, %p2217_p8 }
  0x29   : > { %p2220_p0 = pnand %p2219_p9, %p2213_p4 }
  0x2b   : > { %2223 = shalt.err (!%p2220_p0)
}
  0x2c   : > { %s2224_s6 = scalar_lea.vmem %s2513_s11, 20480  ;;  %s2405_s10 = smov [#allocation5]  }
  0x2d   : > { %p2225_p1 = scmp.ne.s32.totalorder %s2513_s11, %s2224_s6  ;;  %s2229_s20 = sshll.u32 %s2405_s10, 4  ;;  %s2230_s20 = int_to_ptr.vmem [resolvable:$false] %s2229_s20 }
  0x2e   : > { %s2231_s22 = scalar_lea.vmem %s2230_s20, 40960  ;;  %p2232_p11 = scmp.lt.s32.totalorder %s2513_s11, %s2230_s20 }
  0x2f   : > { %p2227_p3 = pnand %p2225_p1, %p2522_p2  ;;  %p2233_p6 = scmp.lt.s32.totalorder %s2231_s22, %s2224_s6 }
  0x31   : > { %p2228_p12 = pneg %p2227_p3  ;;  %p2234_p5 = por %p2233_p6, %p2232_p11 }
  0x33   : > { %p2235_p7 = pnand %p2234_p5, %p2228_p12 }
  0x35   : > { %2238 = shalt.err (!%p2235_p7)
}
  0x36   : > { %s3387_s13 = smov 128   ;;  %s3389_s23 = smov 8  }
  0x37   : > { %2161 = dma.hbm_to_vmem [thread:$0]  (!%p2501_p13), %s2510_s9, 20480, %s2513_s11, %s2516_s12, %s3387_s13, %s3387_s13, %s3389_s23  }
  0x38   : > { %p256_p6 = scmp.lt.s32.totalorder %s2403_s18, 3  ;;  %s3400_s0 = sld [smem:[#allocation16_spill]] }
  0x39   : > { %p3401_p9 = scmp.ge.s32.totalorder %s2403_s18, 1  ;;  %s178_s20 = scalar_lea.vmem [#allocation2], %s2499_s30 }
  0x3a   : > { %s185_s22 = sshll.u32 %s178_s20, 4  ;;  %s175_s9 = scalar_lea.sflag [#allocation3], %s2493_s28  ;;  %s2563_s22 = int_to_ptr.vmem [resolvable:$true] %s185_s22 }
  0x3b   : > { %p2558_p11 = pnand %p3401_p9, %p256_p6 }
  0x3d   : > { %s3402_s10 = scalar_select %p2558_p11, 1, 0 }
  0x3e   : > { %s2554_s6 = scalar_lea.hbm %s3400_s0, %s2496_s29  ;;  %s2244_s13 = scalar_lea.hbm %s3400_s0, 40960 }
  0x3f   : > { %s2239_s11 = scalar_lea.hbm %s2554_s6, 20480  ;;  %p2245_p8 = scmp.lt.u32.totalorder %s2554_s6, %s3400_s0 }
  0x40   : > { %p2240_p12 = scmp.ne.s32.totalorder %s2554_s6, %s2239_s11  ;;  %p2246_p10 = scmp.lt.u32.totalorder %s2244_s13, %s2239_s11 }
  0x41   : > { %p2248_p3 = scmp.lt.u32.totalorder %s2239_s11, %s2554_s6 }
  0x42   : > { %p2242_p0 = pnand %p2240_p12, %p2522_p2  ;;  %p2247_p1 = por %p2246_p10, %p2245_p8 }
  0x44   : > { %p2243_p4 = pneg %p2242_p0  ;;  %p2249_p5 = por %p2248_p3, %p2247_p1 }
  0x46   : > { %p2250_p7 = pnand %p2249_p5, %p2243_p4 }
  0x48   : > { %2253 = shalt.err (!%p2250_p7)
}
  0x49   : > { %s2254_s20 = scalar_lea.vmem %s2563_s22, 20480  ;;  %s2408_s7 = smov [#allocation2]  }
  0x4a   : > { %p2255_p6 = scmp.ne.s32.totalorder %s2563_s22, %s2254_s20  ;;  %s2259_s8 = sshll.u32 %s2408_s7, 4  ;;  %s2260_s8 = int_to_ptr.vmem [resolvable:$false] %s2259_s8 }
  0x4b   : > { %s2261_s1 = scalar_lea.vmem %s2260_s8, 40960  ;;  %p2262_p0 = scmp.lt.s32.totalorder %s2563_s22, %s2260_s8 }
  0x4c   : > { %p2257_p9 = pnand %p2255_p6, %p2522_p2  ;;  %p2263_p11 = scmp.lt.s32.totalorder %s2261_s1, %s2254_s20 }
  0x4e   : > { %p2258_p12 = pneg %p2257_p9  ;;  %p2264_p8 = por %p2263_p11, %p2262_p0 }
  0x50   : > { %p2265_p10 = pnand %p2264_p8, %p2258_p12 }
  0x52   : > { %2268 = shalt.err (!%p2265_p10)
}
  0x53   : > { %s3403_s13 = smov 8   ;;  %s3404_s23 = smov 128  }
  0x54   : > { %2158 = dma.hbm_to_vmem [thread:$0]  (!%p2501_p13), %s2554_s6, 20480, %s2563_s22, %s175_s9, %s3404_s23, %s3404_s23, %s3403_s13  }
  0x55   : > { %s2596_s20 = scalar_lea.hbm %s3382_s2, %s2496_s29  ;;  %s220_s8 = scalar_lea.vmem [#allocation7], %s2499_s30 }
  0x56   : > { %s227_s1 = sshll.u32 %s220_s8, 4  ;;  %s2269_s0 = scalar_lea.hbm %s2596_s20, 20480  ;;  %s2599_s1 = int_to_ptr.vmem [resolvable:$true] %s227_s1 }
  0x57   : > { %p2270_p11 = scmp.ne.s32.totalorder %s2596_s20, %s2269_s0  ;;  %s2274_s22 = scalar_lea.hbm %s3382_s2, 40960 }
  0x58   : > { %p2275_p3 = scmp.lt.u32.totalorder %s2596_s20, %s3382_s2  ;;  %p2276_p5 = scmp.lt.u32.totalorder %s2274_s22, %s2269_s0 }
  0x59   : > { %p2272_p4 = pnand %p2270_p11, %p2522_p2  ;;  %p2278_p6 = scmp.lt.u32.totalorder %s2269_s0, %s2596_s20 }
  0x5a   : > { %p2277_p7 = por %p2276_p5, %p2275_p3 }
  0x5b   : > { %p2273_p1 = pneg %p2272_p4 }
  0x5c   : > { %p2279_p9 = por %p2278_p6, %p2277_p7 }
  0x5e   : > { %p2280_p12 = pnand %p2279_p9, %p2273_p1 }
  0x60   : > { %2283 = shalt.err (!%p2280_p12)
}
  0x61   : > { %s2284_s7 = scalar_lea.vmem %s2599_s1, 20480  ;;  %s2409_s24 = smov [#allocation7]  }
  0x62   : > { %p2285_p0 = scmp.ne.s32.totalorder %s2599_s1, %s2284_s7  ;;  %s2289_s8 = sshll.u32 %s2409_s24, 4  ;;  %s2290_s8 = int_to_ptr.vmem [resolvable:$false] %s2289_s8 }
  0x63   : > { %s2291_s6 = scalar_lea.vmem %s2290_s8, 40960  ;;  %p2292_p11 = scmp.lt.s32.totalorder %s2599_s1, %s2290_s8 }
  0x64   : > { %p2287_p8 = pnand %p2285_p0, %p2522_p2  ;;  %p2293_p4 = scmp.lt.s32.totalorder %s2291_s6, %s2284_s7 }
  0x66   : > { %p2288_p10 = pneg %p2287_p8  ;;  %p2294_p3 = por %p2293_p4, %p2292_p11 }
  0x68   : > { %p2295_p5 = pnand %p2294_p3, %p2288_p10 }
  0x6a   : > { %2298 = shalt.err (!%p2295_p5)
}
  0x6b   : > { %2164 = dma.hbm_to_vmem [thread:$0]  (!%p2501_p13), %s2596_s20, 20480, %s2599_s1, %s2516_s12, %s3404_s23, %s3404_s23, %s3403_s13  }
  0x6c   : > { %s2630_s9 = scalar_lea.hbm %s3383_s3, %s2496_s29  ;;  %s241_s11 = scalar_lea.vmem [#allocation8], %s2499_s30 }
  0x6d   : > { %s248_s7 = sshll.u32 %s241_s11, 4  ;;  %s238_s24 = scalar_lea.sflag [#allocation9], %s2493_s28  ;;  %s2633_s7 = int_to_ptr.vmem [resolvable:$true] %s248_s7 }
  0x6e   : > { %s2299_s8 = scalar_lea.hbm %s2630_s9, 20480  ;;  %s2304_s1 = scalar_lea.hbm %s3383_s3, 40960 }
  0x6f   : > { %p2300_p1 = scmp.ne.s32.totalorder %s2630_s9, %s2299_s8  ;;  %p2305_p9 = scmp.lt.u32.totalorder %s2630_s9, %s3383_s3 }
  0x70   : > { %p2306_p12 = scmp.lt.u32.totalorder %s2304_s1, %s2299_s8  ;;  %p2308_p8 = scmp.lt.u32.totalorder %s2299_s8, %s2630_s9 }
  0x71   : > { %p2302_p7 = pnand %p2300_p1, %p2522_p2 }
  0x72   : > { %p2307_p0 = por %p2306_p12, %p2305_p9 }
  0x73   : > { %p2303_p6 = pneg %p2302_p7 }
  0x74   : > { %p2309_p10 = por %p2308_p8, %p2307_p0 }
  0x76   : > { %p2310_p11 = pnand %p2309_p10, %p2303_p6 }
  0x78   : > { %2313 = shalt.err (!%p2310_p11)
}
  0x79   : > { %s2314_s30 = scalar_lea.vmem %s2633_s7, 20480  ;;  %s2410_s0 = smov [#allocation8]  }
  0x7a   : > { %p2315_p4 = scmp.ne.s32.totalorder %s2633_s7, %s2314_s30  ;;  %s2319_s22 = sshll.u32 %s2410_s0, 4  ;;  %s2320_s22 = int_to_ptr.vmem [resolvable:$false] %s2319_s22 }
  0x7b   : > { %s2321_s11 = scalar_lea.vmem %s2320_s22, 40960  ;;  %p2322_p1 = scmp.lt.s32.totalorder %s2633_s7, %s2320_s22 }
  0x7c   : > { %p2317_p3 = pnand %p2315_p4, %p2522_p2  ;;  %p2323_p7 = scmp.lt.s32.totalorder %s2321_s11, %s2314_s30 }
  0x7e   : > { %p2318_p5 = pneg %p2317_p3  ;;  %p2324_p9 = por %p2323_p7, %p2322_p1 }
  0x80   : > { %p2325_p12 = pnand %p2324_p9, %p2318_p5 }
  0x82   : > { %2328 = shalt.err (!%p2325_p12)
}
  0x83   : > { %2167 = dma.hbm_to_vmem [thread:$0]  (!%p2501_p13), %s2630_s9, 20480, %s2633_s7, %s238_s24, %s3404_s23, %s3404_s23, %s3403_s13  }
  0x84   : > { %p3405_p2 = scmp.ne.s32.totalorder %s3402_s10, 0 }
  0x85   : > { %s2665_s14 = sand.u32 (!%p3405_p2), 1, %s2395_s16   ;;  %p3406_p6 = scmp.ne.s32.totalorder (!%p3405_p2), %s3394_s25, 0 }
  0x86   : > { %260 = sbr.rel (%p3405_p2) target bundleno = 522 (0x20a), region = 36  ;;  %s263_s12 = scalar_lea.sflag (!%p3405_p2), [#allocation3], %s2665_s14 }
  0x87   : > { %s2144_s8 = smul.u32 (!%p3405_p2), 1280, %s2665_s14 }
  0x89   : > { %s2669_s5 = scalar_lea.vmem (!%p3405_p2), [#allocation2], %s2144_s8 }
  0x8d   : > { %2374 = dma.done.wait (%p3406_p6), %s263_s12, 20480  }
  0x8e   : > { %2376 = vsyncadd (%p3406_p6), %s263_s12, 4294946816  ;;  %s271_s28 = sand.u32 1, %s2459_s19   ;;  %s2676_s13 = scalar_lea.vmem [#allocation5], %s2144_s8 }
  0x8f   : > { %s272_s10 = scalar_lea.sflag [#allocation6], %s271_s28 }
  0x90   : > { %2378 = dma.done.wait (%p3406_p6), %s272_s10, 40960  }
  0x91   : > { %2380 = vsyncadd (%p3406_p6), %s272_s10, 4294926336  ;;  %s2682_s23 = scalar_lea.vmem [#allocation7], %s2144_s8  ;;  %s290_s9 = scalar_lea.sflag [#allocation9], %s2665_s14 }
  0x92   : > { %s2685_s7 = scalar_lea.vmem [#allocation8], %s2144_s8 }
  0x93   : > { %2382 = dma.done.wait (%p3406_p6), %s290_s9, 20480  }
  0x94   : > { %2384 = vsyncadd (%p3406_p6), %s290_s9, 4294946816  ;;  %v337_v0 = vld [vmem:[%s2669_s5] sm:$0xff]  ;;  %v338_v1 = vld [vmem:[%s2669_s5 + $0x8] sm:$0xff]  ;;  %s2129_s25 = sshll.u32 %s2665_s14, 1  ;;  %s2139_s24 = sshll.u32 %s2459_s19, 5 }
  0x95   : > { %v497_v2 = vld [vmem:[%s2676_s13] sm:$0xff]  ;;  %v498_v3 = vld [vmem:[%s2676_s13 + $0x8] sm:$0xff]  ;;  %v339_v4 = vld [vmem:[%s2669_s5 + $0x10] sm:$0xff]  ;;  %s332_s20 = scalar_lea.vmem [#allocation10], %s2129_s25  ;;  %s3336_s30 = scalar_lea.hbm %s3384_s4, %s2139_s24 }
  0x96   : > { %v499_v5 = vld [vmem:[%s2676_s13 + $0x10] sm:$0xff]  ;;  %v657_v6 = vsub.f32 %v337_v0, %v497_v2  ;;  %v658_v7 = vsub.f32 %v338_v1, %v498_v3  ;;  %v340_v8 = vld [vmem:[%s2669_s5 + $0x18] sm:$0xff]  ;;  %v341_v11 = vld [vmem:[%s2669_s5 + $0x20] sm:$0xff]  ;;  %s1985_s1 = sshll.u32 %s332_s20, 4  ;;  %s1971_s0 = scalar_lea.sflag [#allocation4], %s2665_s14  ;;  %s3338_s1 = int_to_ptr.vmem [resolvable:$true] %s1985_s1 }
  0x97   : > { %v500_v9 = vld [vmem:[%s2676_s13 + $0x18] sm:$0xff]  ;;  %v659_v10 = vsub.f32 %v339_v4, %v499_v5  ;;  %v501_v12 = vld [vmem:[%s2676_s13 + $0x20] sm:$0xff]  ;;  %v342_v16 = vld [vmem:[%s2669_s5 + $0x28] sm:$0xff]  ;;  %s2329_s22 = scalar_lea.vmem %s3338_s1, 32  ;;  %p3407_p0 = scmp.ne.s32.totalorder %s3395_s26, 0 }
  0x98   : > { %v660_v13 = vsub.f32 %v340_v8, %v500_v9  ;;  %v817_v14 = vmul.f32 %v657_v6, %v657_v6  ;;  %v818_v15 = vmul.f32 %v658_v7, %v658_v7  ;;  %v502_v17 = vld [vmem:[%s2676_s13 + $0x28] sm:$0xff]  ;;  %v661_v18 = vsub.f32 %v341_v11, %v501_v12  ;;  %v343_v20 = vld [vmem:[%s2669_s5 + $0x30] sm:$0xff]  ;;  %v344_v25 = vld [vmem:[%s2669_s5 + $0x38] sm:$0xff]  ;;  %p2330_p13 = scmp.ne.s32.totalorder %s3338_s1, %s2329_s22  ;;  %s2412_s19 = smov [#allocation10]  }
  0x99   : > { %v819_v19 = vmul.f32 %v659_v10, %v659_v10  ;;  %v503_v21 = vld [vmem:[%s2676_s13 + $0x30] sm:$0xff]  ;;  %v662_v22 = vsub.f32 %v342_v16, %v502_v17  ;;  %v504_v26 = vld [vmem:[%s2676_s13 + $0x38] sm:$0xff]  ;;  %v345_v30 = vld [vmem:[%s2669_s5 + $0x40] sm:$0xff]  ;;  %s2333_s11 = sshll.u32 %s2412_s19, 4  ;;  %s2334_s11 = int_to_ptr.vmem [resolvable:$false] %s2333_s11 }
  0x9a   : > { %v820_v23 = vmul.f32 %v660_v13, %v660_v13  ;;  %v977_v24 = vadd.f32 %v818_v15, %v817_v14  ;;  %v663_v27 = vsub.f32 %v343_v20, %v503_v21  ;;  %v821_v28 = vmul.f32 %v661_v18, %v661_v18  ;;  %v505_v31 = vld [vmem:[%s2676_s13 + $0x40] sm:$0xff]  ;;  %v346_v35 = vld [vmem:[%s2669_s5 + $0x48] sm:$0xff]  ;;  %v347_v40 = vld [vmem:[%s2669_s5 + $0x50] sm:$0xff]  ;;  %p2331_p8 = pnand %p2330_p13, %p3407_p0  ;;  %s2335_s8 = scalar_lea.vmem %s2334_s11, 64 }
  0x9b   : > { %v664_v32 = vsub.f32 %v344_v25, %v504_v26  ;;  %v822_v33 = vmul.f32 %v662_v22, %v662_v22  ;;  %v506_v36 = vld [vmem:[%s2676_s13 + $0x48] sm:$0xff]  ;;  %v665_v37 = vsub.f32 %v345_v30, %v505_v31  ;;  %v507_v41 = vld [vmem:[%s2676_s13 + $0x50] sm:$0xff]  ;;  %v348_v45 = vld [vmem:[%s2669_s5 + $0x58] sm:$0xff]  ;;  %p2336_p11 = scmp.lt.s32.totalorder %s3338_s1, %s2334_s11  ;;  %p2337_p4 = scmp.lt.s32.totalorder %s2335_s8, %s2329_s22 }
  0x9c   : > { %v978_v29 = vadd.f32 %v977_v24, %v819_v19  ;;  %v823_v38 = vmul.f32 %v663_v27, %v663_v27  ;;  %v666_v42 = vsub.f32 %v346_v35, %v506_v36  ;;  %v508_v46 = vld [vmem:[%s2676_s13 + $0x58] sm:$0xff]  ;;  %v667_v47 = vsub.f32 %v347_v40, %v507_v41  ;;  %v349_v50 = vld [vmem:[%s2669_s5 + $0x60] sm:$0xff]  ;;  %v350_v55 = vld [vmem:[%s2669_s5 + $0x68] sm:$0xff]  ;;  %p2332_p10 = pneg %p2331_p8 }
  0x9d   : > { %v824_v43 = vmul.f32 %v664_v32, %v664_v32  ;;  %v825_v48 = vmul.f32 %v665_v37, %v665_v37  ;;  %v509_v51 = vld [vmem:[%s2676_s13 + $0x60] sm:$0xff]  ;;  %v668_v52 = vsub.f32 %v348_v45, %v508_v46  ;;  %v510_v56 = vld [vmem:[%s2676_s13 + $0x68] sm:$0xff]  ;;  %v351_v60 = vld [vmem:[%s2669_s5 + $0x70] sm:$0xff]  ;;  %p2338_p3 = por %p2337_p4, %p2336_p11 }
  0x9e   : > { %v979_v34 = vadd.f32 %v978_v29, %v820_v23  ;;  %v826_v53 = vmul.f32 %v666_v42, %v666_v42  ;;  %v669_v57 = vsub.f32 %v349_v50, %v509_v51  ;;  %v827_v58 = vmul.f32 %v667_v47, %v667_v47  ;;  %v511_v61 = vld [vmem:[%s2676_s13 + $0x70] sm:$0xff]  ;;  %v1142_v62 = vld [vmem:[%s2682_s23] sm:$0xff]  ;;  %v1143_v2 = vld [vmem:[%s2682_s23 + $0x8] sm:$0xff] }
  0x9f   : > { %v670_v63 = vsub.f32 %v350_v55, %v510_v56  ;;  %v828_v0 = vmul.f32 %v668_v52, %v668_v52  ;;  %v1302_v3 = vld [vmem:[%s2685_s7] sm:$0xff]  ;;  %v1303_v4 = vld [vmem:[%s2685_s7 + $0x8] sm:$0xff]  ;;  %v352_v5 = vld [vmem:[%s2669_s5 + $0x78] sm:$0xff]  ;;  %v671_v7 = vsub.f32 %v351_v60, %v511_v61  ;;  %p2339_p5 = pnand %p2338_p3, %p2332_p10 }
  0xa0   : > { %v980_v39 = vadd.f32 %v979_v34, %v821_v28  ;;  %v512_v6 = vld [vmem:[%s2676_s13 + $0x78] sm:$0xff]  ;;  %v829_v8 = vmul.f32 %v669_v57, %v669_v57  ;;  %v1144_v10 = vld [vmem:[%s2682_s23 + $0x10] sm:$0xff]  ;;  %v353_v12 = vld [vmem:[%s2669_s5 + $0x80] sm:$0xff]  ;;  %v1462_v14 = vsub.f32 %v1142_v62, %v1302_v3  ;;  %v1463_v15 = vsub.f32 %v1143_v2, %v1303_v4 }
  0xa1   : > { %v1304_v11 = vld [vmem:[%s2685_s7 + $0x10] sm:$0xff]  ;;  %v513_v13 = vld [vmem:[%s2676_s13 + $0x80] sm:$0xff]  ;;  %v672_v16 = vsub.f32 %v352_v5, %v512_v6  ;;  %v830_v17 = vmul.f32 %v670_v63, %v670_v63  ;;  %v1145_v19 = vld [vmem:[%s2682_s23 + $0x18] sm:$0xff]  ;;  %v831_v25 = vmul.f32 %v671_v7, %v671_v7 }
  0xa2   : > { %v981_v44 = vadd.f32 %v980_v39, %v822_v33  ;;  %v1305_v20 = vld [vmem:[%s2685_s7 + $0x18] sm:$0xff]  ;;  %v354_v21 = vld [vmem:[%s2669_s5 + $0x88] sm:$0xff]  ;;  %v1464_v23 = vsub.f32 %v1144_v10, %v1304_v11  ;;  %v673_v24 = vsub.f32 %v353_v12, %v513_v13  ;;  %v1146_v27 = vld [vmem:[%s2682_s23 + $0x20] sm:$0xff]  ;;  %v1622_v32 = vand.u32 2147483647, %v1462_v14 }
  0xa3   : > { %v514_v22 = vld [vmem:[%s2676_s13 + $0x88] sm:$0xff]  ;;  %v1306_v28 = vld [vmem:[%s2685_s7 + $0x20] sm:$0xff]  ;;  %v355_v29 = vld [vmem:[%s2669_s5 + $0x90] sm:$0xff]  ;;  %v1465_v31 = vsub.f32 %v1145_v19, %v1305_v20  ;;  %v1623_v33 = vand.u32 2147483647, %v1463_v15  ;;  %v832_v35 = vmul.f32 %v672_v16, %v672_v16 }
  0xa4   : > { %v982_v49 = vadd.f32 %v981_v44, %v823_v38  ;;  %v515_v30 = vld [vmem:[%s2676_s13 + $0x90] sm:$0xff]  ;;  %v674_v34 = vsub.f32 %v354_v21, %v514_v22  ;;  %v1147_v37 = vld [vmem:[%s2682_s23 + $0x28] sm:$0xff]  ;;  %v356_v39 = vld [vmem:[%s2669_s5 + $0x98] sm:$0xff]  ;;  %v1466_v41 = vsub.f32 %v1146_v27, %v1306_v28  ;;  %v1624_v42 = vand.u32 2147483647, %v1464_v23 }
  0xa5   : > { %v1307_v38 = vld [vmem:[%s2685_s7 + $0x28] sm:$0xff]  ;;  %v516_v40 = vld [vmem:[%s2676_s13 + $0x98] sm:$0xff]  ;;  %v833_v44 = vmul.f32 %v673_v24, %v673_v24  ;;  %v1148_v46 = vld [vmem:[%s2682_s23 + $0x30] sm:$0xff]  ;;  %v1625_v51 = vand.u32 2147483647, %v1465_v31  ;;  %v1782_v52 = vadd.f32 %v1623_v33, %v1622_v32 }
  0xa6   : > { %v983_v54 = vadd.f32 %v982_v49, %v824_v43  ;;  %v675_v43 = vsub.f32 %v355_v29, %v515_v30  ;;  %v1308_v47 = vld [vmem:[%s2685_s7 + $0x30] sm:$0xff]  ;;  %v517_v49 = vld [vmem:[%s2676_s13 + $0xa0] sm:$0xff]  ;;  %v1467_v50 = vsub.f32 %v1147_v37, %v1307_v38  ;;  %v1149_v56 = vld [vmem:[%s2682_s23 + $0x38] sm:$0xff]  ;;  %v1626_v61 = vand.u32 2147483647, %v1466_v41 }
  0xa7   : > { %v1309_v57 = vld [vmem:[%s2685_s7 + $0x38] sm:$0xff]  ;;  %v1468_v60 = vsub.f32 %v1148_v46, %v1308_v47  ;;  %v1783_v62 = vadd.f32 %v1782_v52, %v1624_v42  ;;  %v1150_v2 = vld [vmem:[%s2682_s23 + $0x40] sm:$0xff]  ;;  %v359_v4 = vld [vmem:[%s2669_s5 + $0xb0] sm:$0xff] }
  0xa8   : > { %v984_v59 = vadd.f32 %v983_v54, %v825_v48  ;;  %v357_v48 = vld [vmem:[%s2669_s5 + $0xa0] sm:$0xff]  ;;  %v834_v54 = vmul.f32 %v674_v34, %v674_v34  ;;  %v519_v5 = vld [vmem:[%s2676_s13 + $0xb0] sm:$0xff]  ;;  %v1469_v6 = vsub.f32 %v1149_v56, %v1309_v57  ;;  %v1627_v7 = vand.u32 2147483647, %v1467_v50  ;;  %v1151_v12 = vld [vmem:[%s2682_s23 + $0x48] sm:$0xff] }
  0xa9   : > { %v677_v63 = vsub.f32 %v357_v48, %v517_v49  ;;  %v1310_v3 = vld [vmem:[%s2685_s7 + $0x40] sm:$0xff]  ;;  %v1311_v13 = vld [vmem:[%s2685_s7 + $0x48] sm:$0xff]  ;;  %v360_v14 = vld [vmem:[%s2669_s5 + $0xb8] sm:$0xff]  ;;  %v679_v19 = vsub.f32 %v359_v4, %v519_v5 }
  0xaa   : > { %v985_v1 = vadd.f32 %v984_v59, %v826_v53  ;;  %v676_v53 = vsub.f32 %v356_v39, %v516_v40  ;;  %v518_v59 = vld [vmem:[%s2676_s13 + $0xa8] sm:$0xff]  ;;  %v520_v15 = vld [vmem:[%s2676_s13 + $0xb8] sm:$0xff]  ;;  %v1470_v16 = vsub.f32 %v1150_v2, %v1310_v3  ;;  %v1152_v22 = vld [vmem:[%s2682_s23 + $0x50] sm:$0xff]  ;;  %v1629_v27 = vand.u32 2147483647, %v1469_v6 }
  0xab   : > { %v837_v20 = vmul.f32 %v677_v63, %v677_v63  ;;  %v1312_v23 = vld [vmem:[%s2685_s7 + $0x50] sm:$0xff]  ;;  %v361_v24 = vld [vmem:[%s2669_s5 + $0xc0] sm:$0xff]  ;;  %v680_v29 = vsub.f32 %v360_v14, %v520_v15  ;;  %v1153_v32 = vld [vmem:[%s2682_s23 + $0x58] sm:$0xff]  ;;  %v839_v40 = vmul.f32 %v679_v19, %v679_v19 }
  0xac   : > { %v986_v9 = vadd.f32 %v985_v1, %v827_v58  ;;  %v358_v58 = vld [vmem:[%s2669_s5 + $0xa8] sm:$0xff]  ;;  %v836_v10 = vmul.f32 %v676_v53, %v676_v53  ;;  %v1313_v33 = vld [vmem:[%s2685_s7 + $0x58] sm:$0xff]  ;;  %v1630_v37 = vand.u32 2147483647, %v1470_v16  ;;  %v1154_v42 = vld [vmem:[%s2682_s23 + $0x60] sm:$0xff] }
  0xad   : > { %v362_v34 = vld [vmem:[%s2669_s5 + $0xc8] sm:$0xff]  ;;  %v1473_v46 = vsub.f32 %v1153_v32, %v1313_v33  ;;  %v840_v50 = vmul.f32 %v680_v29, %v680_v29  ;;  %v1316_v63 = vld [vmem:[%s2685_s7 + $0x70] sm:$0xff]  ;;  %v1318_v19 = vld [vmem:[%s2685_s7 + $0x80] sm:$0xff] }
  0xae   : > { %v987_v18 = vadd.f32 %v986_v9, %v828_v0  ;;  %v835_v0 = vmul.f32 %v675_v43, %v675_v43  ;;  %v678_v9 = vsub.f32 %v358_v58, %v518_v59  ;;  %v1314_v43 = vld [vmem:[%s2685_s7 + $0x60] sm:$0xff]  ;;  %v1155_v52 = vld [vmem:[%s2682_s23 + $0x68] sm:$0xff] }
  0xaf   : > { %v1315_v53 = vld [vmem:[%s2685_s7 + $0x68] sm:$0xff]  ;;  %v1474_v56 = vsub.f32 %v1154_v42, %v1314_v43  ;;  %v1633_v3 = vand.u32 2147483647, %v1473_v46 }
  0xb0   : > { %v988_v26 = vadd.f32 %v987_v18, %v829_v8  ;;  %v1784_v8 = vadd.f32 %v1783_v62, %v1625_v51  ;;  %v838_v30 = vmul.f32 %v678_v9, %v678_v9  ;;  %v1156_v62 = vld [vmem:[%s2682_s23 + $0x70] sm:$0xff]  ;;  %v1475_v2 = vsub.f32 %v1155_v52, %v1315_v53  ;;  %v1317_v9 = vld [vmem:[%s2685_s7 + $0x78] sm:$0xff]  ;;  %v1319_v29 = vld [vmem:[%s2685_s7 + $0x88] sm:$0xff] }
  0xb2   : > { %v989_v36 = vadd.f32 %v988_v26, %v830_v17  ;;  %v1628_v17 = vand.u32 2147483647, %v1468_v60  ;;  %v1785_v18 = vadd.f32 %v1784_v8, %v1626_v61  ;;  %v1471_v26 = vsub.f32 %v1151_v12, %v1311_v13  ;;  %v1157_v8 = vld [vmem:[%s2682_s23 + $0x78] sm:$0xff] }
  0xb3   : > { %v1476_v12 = vsub.f32 %v1156_v62, %v1316_v63  ;;  %v1634_v13 = vand.u32 2147483647, %v1474_v56 }
  0xb4   : > { %v990_v45 = vadd.f32 %v989_v36, %v831_v25  ;;  %v521_v25 = vld [vmem:[%s2676_s13 + $0xc0] sm:$0xff]  ;;  %v1786_v28 = vadd.f32 %v1785_v18, %v1627_v7  ;;  %v1472_v36 = vsub.f32 %v1152_v22, %v1312_v23  ;;  %v1631_v47 = vand.u32 2147483647, %v1471_v26 }
  0xb5   : > { %v681_v39 = vsub.f32 %v361_v24, %v521_v25  ;;  %v1158_v18 = vld [vmem:[%s2682_s23 + $0x80] sm:$0xff]  ;;  %v1477_v22 = vsub.f32 %v1157_v8, %v1317_v9  ;;  %v1635_v23 = vand.u32 2147483647, %v1475_v2  ;;  %v1636_v33 = vand.u32 2147483647, %v1476_v12 }
  0xb6   : > { %v991_v55 = vadd.f32 %v990_v45, %v832_v35  ;;  %v522_v35 = vld [vmem:[%s2676_s13 + $0xc8] sm:$0xff]  ;;  %v1787_v38 = vadd.f32 %v1786_v28, %v1628_v17  ;;  %v523_v45 = vld [vmem:[%s2676_s13 + $0xd0] sm:$0xff]  ;;  %v1632_v57 = vand.u32 2147483647, %v1472_v36  ;;  %v1478_v32 = vsub.f32 %v1158_v18, %v1318_v19 }
  0xb7   : > { %v682_v49 = vsub.f32 %v362_v34, %v522_v35  ;;  %v841_v60 = vmul.f32 %v681_v39, %v681_v39  ;;  %v1159_v28 = vld [vmem:[%s2682_s23 + $0x88] sm:$0xff]  ;;  %v1320_v39 = vld [vmem:[%s2685_s7 + $0x90] sm:$0xff]  ;;  %v1637_v43 = vand.u32 2147483647, %v1477_v22 }
  0xb8   : > { %v992_v1 = vadd.f32 %v991_v55, %v833_v44  ;;  %v363_v44 = vld [vmem:[%s2669_s5 + $0xd0] sm:$0xff]  ;;  %v1788_v48 = vadd.f32 %v1787_v38, %v1629_v27  ;;  %v524_v55 = vld [vmem:[%s2676_s13 + $0xd8] sm:$0xff]  ;;  %v1479_v42 = vsub.f32 %v1159_v28, %v1319_v29  ;;  %v1638_v53 = vand.u32 2147483647, %v1478_v32 }
  0xb9   : > { %v683_v59 = vsub.f32 %v363_v44, %v523_v45  ;;  %v842_v6 = vmul.f32 %v682_v49, %v682_v49  ;;  %v1160_v38 = vld [vmem:[%s2682_s23 + $0x90] sm:$0xff]  ;;  %v1321_v49 = vld [vmem:[%s2685_s7 + $0x98] sm:$0xff] }
  0xba   : > { %v993_v11 = vadd.f32 %v992_v1, %v834_v54  ;;  %v364_v54 = vld [vmem:[%s2669_s5 + $0xd8] sm:$0xff]  ;;  %v1789_v58 = vadd.f32 %v1788_v48, %v1630_v37  ;;  %v525_v1 = vld [vmem:[%s2676_s13 + $0xe0] sm:$0xff]  ;;  %v1480_v52 = vsub.f32 %v1160_v38, %v1320_v39  ;;  %v1639_v63 = vand.u32 2147483647, %v1479_v42 }
  0xbb   : > { %v684_v5 = vsub.f32 %v364_v54, %v524_v55  ;;  %v843_v16 = vmul.f32 %v683_v59, %v683_v59  ;;  %v1161_v48 = vld [vmem:[%s2682_s23 + $0x98] sm:$0xff]  ;;  %v1322_v59 = vld [vmem:[%s2685_s7 + $0xa0] sm:$0xff] }
  0xbc   : > { %v994_v21 = vadd.f32 %v993_v11, %v835_v0  ;;  %v365_v0 = vld [vmem:[%s2669_s5 + $0xe0] sm:$0xff]  ;;  %v1790_v4 = vadd.f32 %v1789_v58, %v1631_v47  ;;  %v526_v11 = vld [vmem:[%s2676_s13 + $0xe8] sm:$0xff]  ;;  %v1481_v62 = vsub.f32 %v1161_v48, %v1321_v49  ;;  %v1640_v9 = vand.u32 2147483647, %v1480_v52 }
  0xbd   : > { %v685_v15 = vsub.f32 %v365_v0, %v525_v1  ;;  %v844_v26 = vmul.f32 %v684_v5, %v684_v5  ;;  %v1162_v58 = vld [vmem:[%s2682_s23 + $0xa0] sm:$0xff]  ;;  %v1323_v5 = vld [vmem:[%s2685_s7 + $0xa8] sm:$0xff] }
  0xbe   : > { %v995_v31 = vadd.f32 %v994_v21, %v836_v10  ;;  %v366_v10 = vld [vmem:[%s2669_s5 + $0xe8] sm:$0xff]  ;;  %v1791_v14 = vadd.f32 %v1790_v4, %v1632_v57  ;;  %v527_v21 = vld [vmem:[%s2676_s13 + $0xf0] sm:$0xff]  ;;  %v1482_v8 = vsub.f32 %v1162_v58, %v1322_v59  ;;  %v1641_v19 = vand.u32 2147483647, %v1481_v62 }
  0xbf   : > { %v686_v25 = vsub.f32 %v366_v10, %v526_v11  ;;  %v845_v36 = vmul.f32 %v685_v15, %v685_v15  ;;  %v1163_v4 = vld [vmem:[%s2682_s23 + $0xa8] sm:$0xff]  ;;  %v1324_v15 = vld [vmem:[%s2685_s7 + $0xb0] sm:$0xff] }
  0xc0   : > { %v996_v41 = vadd.f32 %v995_v31, %v837_v20  ;;  %v367_v20 = vld [vmem:[%s2669_s5 + $0xf0] sm:$0xff]  ;;  %v1792_v24 = vadd.f32 %v1791_v14, %v1633_v3  ;;  %v528_v31 = vld [vmem:[%s2676_s13 + $0xf8] sm:$0xff]  ;;  %v1483_v18 = vsub.f32 %v1163_v4, %v1323_v5  ;;  %v1642_v29 = vand.u32 2147483647, %v1482_v8 }
  0xc1   : > { %v687_v35 = vsub.f32 %v367_v20, %v527_v21  ;;  %v846_v46 = vmul.f32 %v686_v25, %v686_v25  ;;  %v1164_v14 = vld [vmem:[%s2682_s23 + $0xb0] sm:$0xff]  ;;  %v1325_v25 = vld [vmem:[%s2685_s7 + $0xb8] sm:$0xff] }
  0xc2   : > { %v997_v51 = vadd.f32 %v996_v41, %v838_v30  ;;  %v368_v30 = vld [vmem:[%s2669_s5 + $0xf8] sm:$0xff]  ;;  %v1793_v34 = vadd.f32 %v1792_v24, %v1634_v13  ;;  %v529_v41 = vld [vmem:[%s2676_s13 + $0x100] sm:$0xff]  ;;  %v1484_v28 = vsub.f32 %v1164_v14, %v1324_v15  ;;  %v1643_v39 = vand.u32 2147483647, %v1483_v18 }
  0xc3   : > { %v688_v45 = vsub.f32 %v368_v30, %v528_v31  ;;  %v847_v56 = vmul.f32 %v687_v35, %v687_v35  ;;  %v1165_v24 = vld [vmem:[%s2682_s23 + $0xb8] sm:$0xff]  ;;  %v1326_v35 = vld [vmem:[%s2685_s7 + $0xc0] sm:$0xff] }
  0xc4   : > { %v998_v61 = vadd.f32 %v997_v51, %v839_v40  ;;  %v369_v40 = vld [vmem:[%s2669_s5 + $0x100] sm:$0xff]  ;;  %v1794_v44 = vadd.f32 %v1793_v34, %v1635_v23  ;;  %v530_v51 = vld [vmem:[%s2676_s13 + $0x108] sm:$0xff]  ;;  %v1485_v38 = vsub.f32 %v1165_v24, %v1325_v25  ;;  %v1644_v49 = vand.u32 2147483647, %v1484_v28 }
  0xc5   : > { %v689_v55 = vsub.f32 %v369_v40, %v529_v41  ;;  %v848_v2 = vmul.f32 %v688_v45, %v688_v45  ;;  %v1166_v34 = vld [vmem:[%s2682_s23 + $0xc0] sm:$0xff]  ;;  %v1327_v45 = vld [vmem:[%s2685_s7 + $0xc8] sm:$0xff] }
  0xc6   : > { %v999_v7 = vadd.f32 %v998_v61, %v840_v50  ;;  %v370_v50 = vld [vmem:[%s2669_s5 + $0x108] sm:$0xff]  ;;  %v1795_v54 = vadd.f32 %v1794_v44, %v1636_v33  ;;  %v531_v61 = vld [vmem:[%s2676_s13 + $0x110] sm:$0xff]  ;;  %v1486_v48 = vsub.f32 %v1166_v34, %v1326_v35  ;;  %v1645_v59 = vand.u32 2147483647, %v1485_v38 }
  0xc7   : > { %v690_v1 = vsub.f32 %v370_v50, %v530_v51  ;;  %v849_v12 = vmul.f32 %v689_v55, %v689_v55  ;;  %v1167_v44 = vld [vmem:[%s2682_s23 + $0xc8] sm:$0xff]  ;;  %v1328_v55 = vld [vmem:[%s2685_s7 + $0xd0] sm:$0xff] }
  0xc8   : > { %v1000_v17 = vadd.f32 %v999_v7, %v841_v60  ;;  %v371_v60 = vld [vmem:[%s2669_s5 + $0x110] sm:$0xff]  ;;  %v1796_v0 = vadd.f32 %v1795_v54, %v1637_v43  ;;  %v532_v7 = vld [vmem:[%s2676_s13 + $0x118] sm:$0xff]  ;;  %v1487_v58 = vsub.f32 %v1167_v44, %v1327_v45  ;;  %v1646_v5 = vand.u32 2147483647, %v1486_v48 }
  0xc9   : > { %v691_v11 = vsub.f32 %v371_v60, %v531_v61  ;;  %v850_v22 = vmul.f32 %v690_v1, %v690_v1  ;;  %v1168_v54 = vld [vmem:[%s2682_s23 + $0xd0] sm:$0xff]  ;;  %v1329_v1 = vld [vmem:[%s2685_s7 + $0xd8] sm:$0xff] }
  0xca   : > { %v1001_v27 = vadd.f32 %v1000_v17, %v842_v6  ;;  %v372_v6 = vld [vmem:[%s2669_s5 + $0x118] sm:$0xff]  ;;  %v1797_v10 = vadd.f32 %v1796_v0, %v1638_v53  ;;  %v533_v17 = vld [vmem:[%s2676_s13 + $0x120] sm:$0xff]  ;;  %v1488_v4 = vsub.f32 %v1168_v54, %v1328_v55  ;;  %v1647_v15 = vand.u32 2147483647, %v1487_v58 }
  0xcb   : > { %v692_v21 = vsub.f32 %v372_v6, %v532_v7  ;;  %v851_v32 = vmul.f32 %v691_v11, %v691_v11  ;;  %v1169_v0 = vld [vmem:[%s2682_s23 + $0xd8] sm:$0xff]  ;;  %v1330_v11 = vld [vmem:[%s2685_s7 + $0xe0] sm:$0xff] }
  0xcc   : > { %v1002_v37 = vadd.f32 %v1001_v27, %v843_v16  ;;  %v373_v16 = vld [vmem:[%s2669_s5 + $0x120] sm:$0xff]  ;;  %v1798_v20 = vadd.f32 %v1797_v10, %v1639_v63  ;;  %v534_v27 = vld [vmem:[%s2676_s13 + $0x128] sm:$0xff]  ;;  %v1489_v14 = vsub.f32 %v1169_v0, %v1329_v1  ;;  %v1648_v25 = vand.u32 2147483647, %v1488_v4 }
  0xcd   : > { %v693_v31 = vsub.f32 %v373_v16, %v533_v17  ;;  %v852_v42 = vmul.f32 %v692_v21, %v692_v21  ;;  %v1170_v10 = vld [vmem:[%s2682_s23 + $0xe0] sm:$0xff]  ;;  %v1331_v21 = vld [vmem:[%s2685_s7 + $0xe8] sm:$0xff] }
  0xce   : > { %v1003_v47 = vadd.f32 %v1002_v37, %v844_v26  ;;  %v374_v26 = vld [vmem:[%s2669_s5 + $0x128] sm:$0xff]  ;;  %v1799_v30 = vadd.f32 %v1798_v20, %v1640_v9  ;;  %v535_v37 = vld [vmem:[%s2676_s13 + $0x130] sm:$0xff]  ;;  %v1490_v24 = vsub.f32 %v1170_v10, %v1330_v11  ;;  %v1649_v35 = vand.u32 2147483647, %v1489_v14 }
  0xcf   : > { %v694_v41 = vsub.f32 %v374_v26, %v534_v27  ;;  %v853_v52 = vmul.f32 %v693_v31, %v693_v31  ;;  %v1171_v20 = vld [vmem:[%s2682_s23 + $0xe8] sm:$0xff]  ;;  %v1332_v31 = vld [vmem:[%s2685_s7 + $0xf0] sm:$0xff] }
  0xd0   : > { %v1004_v57 = vadd.f32 %v1003_v47, %v845_v36  ;;  %v375_v36 = vld [vmem:[%s2669_s5 + $0x130] sm:$0xff]  ;;  %v1800_v40 = vadd.f32 %v1799_v30, %v1641_v19  ;;  %v536_v47 = vld [vmem:[%s2676_s13 + $0x138] sm:$0xff]  ;;  %v1491_v34 = vsub.f32 %v1171_v20, %v1331_v21  ;;  %v1650_v45 = vand.u32 2147483647, %v1490_v24 }
  0xd1   : > { %v695_v51 = vsub.f32 %v375_v36, %v535_v37  ;;  %v854_v62 = vmul.f32 %v694_v41, %v694_v41  ;;  %v1172_v30 = vld [vmem:[%s2682_s23 + $0xf0] sm:$0xff]  ;;  %v1333_v41 = vld [vmem:[%s2685_s7 + $0xf8] sm:$0xff] }
  0xd2   : > { %v1005_v3 = vadd.f32 %v1004_v57, %v846_v46  ;;  %v376_v46 = vld [vmem:[%s2669_s5 + $0x138] sm:$0xff]  ;;  %v1801_v50 = vadd.f32 %v1800_v40, %v1642_v29  ;;  %v537_v57 = vld [vmem:[%s2676_s13 + $0x140] sm:$0xff]  ;;  %v1492_v44 = vsub.f32 %v1172_v30, %v1332_v31  ;;  %v1651_v55 = vand.u32 2147483647, %v1491_v34 }
  0xd3   : > { %v696_v61 = vsub.f32 %v376_v46, %v536_v47  ;;  %v855_v8 = vmul.f32 %v695_v51, %v695_v51  ;;  %v1173_v40 = vld [vmem:[%s2682_s23 + $0xf8] sm:$0xff]  ;;  %v1334_v51 = vld [vmem:[%s2685_s7 + $0x100] sm:$0xff] }
  0xd4   : > { %v1006_v13 = vadd.f32 %v1005_v3, %v847_v56  ;;  %v377_v56 = vld [vmem:[%s2669_s5 + $0x140] sm:$0xff]  ;;  %v1802_v60 = vadd.f32 %v1801_v50, %v1643_v39  ;;  %v538_v3 = vld [vmem:[%s2676_s13 + $0x148] sm:$0xff]  ;;  %v1493_v54 = vsub.f32 %v1173_v40, %v1333_v41  ;;  %v1652_v1 = vand.u32 2147483647, %v1492_v44 }
  0xd5   : > { %v697_v7 = vsub.f32 %v377_v56, %v537_v57  ;;  %v856_v18 = vmul.f32 %v696_v61, %v696_v61  ;;  %v1174_v50 = vld [vmem:[%s2682_s23 + $0x100] sm:$0xff]  ;;  %v1335_v61 = vld [vmem:[%s2685_s7 + $0x108] sm:$0xff] }
  0xd6   : > { %v1007_v23 = vadd.f32 %v1006_v13, %v848_v2  ;;  %v378_v2 = vld [vmem:[%s2669_s5 + $0x148] sm:$0xff]  ;;  %v1803_v6 = vadd.f32 %v1802_v60, %v1644_v49  ;;  %v539_v13 = vld [vmem:[%s2676_s13 + $0x150] sm:$0xff]  ;;  %v1494_v0 = vsub.f32 %v1174_v50, %v1334_v51  ;;  %v1653_v11 = vand.u32 2147483647, %v1493_v54 }
  0xd7   : > { %v698_v17 = vsub.f32 %v378_v2, %v538_v3  ;;  %v857_v28 = vmul.f32 %v697_v7, %v697_v7  ;;  %v1175_v60 = vld [vmem:[%s2682_s23 + $0x108] sm:$0xff]  ;;  %v1336_v7 = vld [vmem:[%s2685_s7 + $0x110] sm:$0xff] }
  0xd8   : > { %v1008_v33 = vadd.f32 %v1007_v23, %v849_v12  ;;  %v379_v12 = vld [vmem:[%s2669_s5 + $0x150] sm:$0xff]  ;;  %v1804_v16 = vadd.f32 %v1803_v6, %v1645_v59  ;;  %v540_v23 = vld [vmem:[%s2676_s13 + $0x158] sm:$0xff]  ;;  %v1495_v10 = vsub.f32 %v1175_v60, %v1335_v61  ;;  %v1654_v21 = vand.u32 2147483647, %v1494_v0 }
  0xd9   : > { %v699_v27 = vsub.f32 %v379_v12, %v539_v13  ;;  %v858_v38 = vmul.f32 %v698_v17, %v698_v17  ;;  %v1176_v6 = vld [vmem:[%s2682_s23 + $0x110] sm:$0xff]  ;;  %v1337_v17 = vld [vmem:[%s2685_s7 + $0x118] sm:$0xff] }
  0xda   : > { %v1009_v43 = vadd.f32 %v1008_v33, %v850_v22  ;;  %v380_v22 = vld [vmem:[%s2669_s5 + $0x158] sm:$0xff]  ;;  %v1805_v26 = vadd.f32 %v1804_v16, %v1646_v5  ;;  %v541_v33 = vld [vmem:[%s2676_s13 + $0x160] sm:$0xff]  ;;  %v1496_v20 = vsub.f32 %v1176_v6, %v1336_v7  ;;  %v1655_v31 = vand.u32 2147483647, %v1495_v10 }
  0xdb   : > { %v700_v37 = vsub.f32 %v380_v22, %v540_v23  ;;  %v859_v48 = vmul.f32 %v699_v27, %v699_v27  ;;  %v1177_v16 = vld [vmem:[%s2682_s23 + $0x118] sm:$0xff]  ;;  %v1338_v27 = vld [vmem:[%s2685_s7 + $0x120] sm:$0xff] }
  0xdc   : > { %v1010_v53 = vadd.f32 %v1009_v43, %v851_v32  ;;  %v381_v32 = vld [vmem:[%s2669_s5 + $0x160] sm:$0xff]  ;;  %v1806_v36 = vadd.f32 %v1805_v26, %v1647_v15  ;;  %v542_v43 = vld [vmem:[%s2676_s13 + $0x168] sm:$0xff]  ;;  %v1497_v30 = vsub.f32 %v1177_v16, %v1337_v17  ;;  %v1656_v41 = vand.u32 2147483647, %v1496_v20 }
  0xdd   : > { %v701_v47 = vsub.f32 %v381_v32, %v541_v33  ;;  %v860_v58 = vmul.f32 %v700_v37, %v700_v37  ;;  %v1178_v26 = vld [vmem:[%s2682_s23 + $0x120] sm:$0xff]  ;;  %v1339_v37 = vld [vmem:[%s2685_s7 + $0x128] sm:$0xff] }
  0xde   : > { %v1011_v63 = vadd.f32 %v1010_v53, %v852_v42  ;;  %v382_v42 = vld [vmem:[%s2669_s5 + $0x168] sm:$0xff]  ;;  %v1807_v46 = vadd.f32 %v1806_v36, %v1648_v25  ;;  %v543_v53 = vld [vmem:[%s2676_s13 + $0x170] sm:$0xff]  ;;  %v1498_v40 = vsub.f32 %v1178_v26, %v1338_v27  ;;  %v1657_v51 = vand.u32 2147483647, %v1497_v30 }
  0xdf   : > { %v702_v57 = vsub.f32 %v382_v42, %v542_v43  ;;  %v861_v4 = vmul.f32 %v701_v47, %v701_v47  ;;  %v1179_v36 = vld [vmem:[%s2682_s23 + $0x128] sm:$0xff]  ;;  %v1340_v47 = vld [vmem:[%s2685_s7 + $0x130] sm:$0xff] }
  0xe0   : > { %v1012_v9 = vadd.f32 %v1011_v63, %v853_v52  ;;  %v383_v52 = vld [vmem:[%s2669_s5 + $0x170] sm:$0xff]  ;;  %v1808_v56 = vadd.f32 %v1807_v46, %v1649_v35  ;;  %v544_v63 = vld [vmem:[%s2676_s13 + $0x178] sm:$0xff]  ;;  %v1499_v50 = vsub.f32 %v1179_v36, %v1339_v37  ;;  %v1658_v61 = vand.u32 2147483647, %v1498_v40 }
  0xe1   : > { %v703_v3 = vsub.f32 %v383_v52, %v543_v53  ;;  %v862_v14 = vmul.f32 %v702_v57, %v702_v57  ;;  %v1180_v46 = vld [vmem:[%s2682_s23 + $0x130] sm:$0xff]  ;;  %v1341_v57 = vld [vmem:[%s2685_s7 + $0x138] sm:$0xff] }
  0xe2   : > { %v1013_v19 = vadd.f32 %v1012_v9, %v854_v62  ;;  %v384_v62 = vld [vmem:[%s2669_s5 + $0x178] sm:$0xff]  ;;  %v1809_v2 = vadd.f32 %v1808_v56, %v1650_v45  ;;  %v545_v9 = vld [vmem:[%s2676_s13 + $0x180] sm:$0xff]  ;;  %v1500_v60 = vsub.f32 %v1180_v46, %v1340_v47  ;;  %v1659_v7 = vand.u32 2147483647, %v1499_v50 }
  0xe3   : > { %v704_v13 = vsub.f32 %v384_v62, %v544_v63  ;;  %v863_v24 = vmul.f32 %v703_v3, %v703_v3  ;;  %v1181_v56 = vld [vmem:[%s2682_s23 + $0x138] sm:$0xff]  ;;  %v1342_v3 = vld [vmem:[%s2685_s7 + $0x140] sm:$0xff] }
  0xe4   : > { %v1014_v29 = vadd.f32 %v1013_v19, %v855_v8  ;;  %v385_v8 = vld [vmem:[%s2669_s5 + $0x180] sm:$0xff]  ;;  %v1810_v12 = vadd.f32 %v1809_v2, %v1651_v55  ;;  %v546_v19 = vld [vmem:[%s2676_s13 + $0x188] sm:$0xff]  ;;  %v1501_v6 = vsub.f32 %v1181_v56, %v1341_v57  ;;  %v1660_v17 = vand.u32 2147483647, %v1500_v60 }
  0xe5   : > { %v705_v23 = vsub.f32 %v385_v8, %v545_v9  ;;  %v864_v34 = vmul.f32 %v704_v13, %v704_v13  ;;  %v1182_v2 = vld [vmem:[%s2682_s23 + $0x140] sm:$0xff]  ;;  %v1343_v13 = vld [vmem:[%s2685_s7 + $0x148] sm:$0xff] }
  0xe6   : > { %v1015_v39 = vadd.f32 %v1014_v29, %v856_v18  ;;  %v386_v18 = vld [vmem:[%s2669_s5 + $0x188] sm:$0xff]  ;;  %v1811_v22 = vadd.f32 %v1810_v12, %v1652_v1  ;;  %v547_v29 = vld [vmem:[%s2676_s13 + $0x190] sm:$0xff]  ;;  %v1502_v16 = vsub.f32 %v1182_v2, %v1342_v3  ;;  %v1661_v27 = vand.u32 2147483647, %v1501_v6 }
  0xe7   : > { %v706_v33 = vsub.f32 %v386_v18, %v546_v19  ;;  %v865_v44 = vmul.f32 %v705_v23, %v705_v23  ;;  %v1183_v12 = vld [vmem:[%s2682_s23 + $0x148] sm:$0xff]  ;;  %v1344_v23 = vld [vmem:[%s2685_s7 + $0x150] sm:$0xff] }
  0xe8   : > { %v1016_v49 = vadd.f32 %v1015_v39, %v857_v28  ;;  %v387_v28 = vld [vmem:[%s2669_s5 + $0x190] sm:$0xff]  ;;  %v1812_v32 = vadd.f32 %v1811_v22, %v1653_v11  ;;  %v548_v39 = vld [vmem:[%s2676_s13 + $0x198] sm:$0xff]  ;;  %v1503_v26 = vsub.f32 %v1183_v12, %v1343_v13  ;;  %v1662_v37 = vand.u32 2147483647, %v1502_v16 }
  0xe9   : > { %v707_v43 = vsub.f32 %v387_v28, %v547_v29  ;;  %v866_v54 = vmul.f32 %v706_v33, %v706_v33  ;;  %v1184_v22 = vld [vmem:[%s2682_s23 + $0x150] sm:$0xff]  ;;  %v1345_v33 = vld [vmem:[%s2685_s7 + $0x158] sm:$0xff] }
  0xea   : > { %v1017_v59 = vadd.f32 %v1016_v49, %v858_v38  ;;  %v388_v38 = vld [vmem:[%s2669_s5 + $0x198] sm:$0xff]  ;;  %v1813_v42 = vadd.f32 %v1812_v32, %v1654_v21  ;;  %v549_v49 = vld [vmem:[%s2676_s13 + $0x1a0] sm:$0xff]  ;;  %v1504_v36 = vsub.f32 %v1184_v22, %v1344_v23  ;;  %v1663_v47 = vand.u32 2147483647, %v1503_v26 }
  0xeb   : > { %v708_v53 = vsub.f32 %v388_v38, %v548_v39  ;;  %v867_v0 = vmul.f32 %v707_v43, %v707_v43  ;;  %v1185_v32 = vld [vmem:[%s2682_s23 + $0x158] sm:$0xff]  ;;  %v1346_v43 = vld [vmem:[%s2685_s7 + $0x160] sm:$0xff] }
  0xec   : > { %v1018_v5 = vadd.f32 %v1017_v59, %v859_v48  ;;  %v389_v48 = vld [vmem:[%s2669_s5 + $0x1a0] sm:$0xff]  ;;  %v1814_v52 = vadd.f32 %v1813_v42, %v1655_v31  ;;  %v550_v59 = vld [vmem:[%s2676_s13 + $0x1a8] sm:$0xff]  ;;  %v1505_v46 = vsub.f32 %v1185_v32, %v1345_v33  ;;  %v1664_v57 = vand.u32 2147483647, %v1504_v36 }
  0xed   : > { %v709_v63 = vsub.f32 %v389_v48, %v549_v49  ;;  %v868_v10 = vmul.f32 %v708_v53, %v708_v53  ;;  %v1186_v42 = vld [vmem:[%s2682_s23 + $0x160] sm:$0xff]  ;;  %v1347_v53 = vld [vmem:[%s2685_s7 + $0x168] sm:$0xff] }
  0xee   : > { %v1019_v15 = vadd.f32 %v1018_v5, %v860_v58  ;;  %v390_v58 = vld [vmem:[%s2669_s5 + $0x1a8] sm:$0xff]  ;;  %v1815_v62 = vadd.f32 %v1814_v52, %v1656_v41  ;;  %v551_v5 = vld [vmem:[%s2676_s13 + $0x1b0] sm:$0xff]  ;;  %v1506_v56 = vsub.f32 %v1186_v42, %v1346_v43  ;;  %v1665_v3 = vand.u32 2147483647, %v1505_v46 }
  0xef   : > { %v710_v9 = vsub.f32 %v390_v58, %v550_v59  ;;  %v869_v20 = vmul.f32 %v709_v63, %v709_v63  ;;  %v1187_v52 = vld [vmem:[%s2682_s23 + $0x168] sm:$0xff]  ;;  %v1348_v63 = vld [vmem:[%s2685_s7 + $0x170] sm:$0xff] }
  0xf0   : > { %v1020_v25 = vadd.f32 %v1019_v15, %v861_v4  ;;  %v391_v4 = vld [vmem:[%s2669_s5 + $0x1b0] sm:$0xff]  ;;  %v1816_v8 = vadd.f32 %v1815_v62, %v1657_v51  ;;  %v552_v15 = vld [vmem:[%s2676_s13 + $0x1b8] sm:$0xff]  ;;  %v1507_v2 = vsub.f32 %v1187_v52, %v1347_v53  ;;  %v1666_v13 = vand.u32 2147483647, %v1506_v56 }
  0xf1   : > { %v711_v19 = vsub.f32 %v391_v4, %v551_v5  ;;  %v870_v30 = vmul.f32 %v710_v9, %v710_v9  ;;  %v1188_v62 = vld [vmem:[%s2682_s23 + $0x170] sm:$0xff]  ;;  %v1349_v9 = vld [vmem:[%s2685_s7 + $0x178] sm:$0xff] }
  0xf2   : > { %v1021_v35 = vadd.f32 %v1020_v25, %v862_v14  ;;  %v392_v14 = vld [vmem:[%s2669_s5 + $0x1b8] sm:$0xff]  ;;  %v1817_v18 = vadd.f32 %v1816_v8, %v1658_v61  ;;  %v553_v25 = vld [vmem:[%s2676_s13 + $0x1c0] sm:$0xff]  ;;  %v1508_v12 = vsub.f32 %v1188_v62, %v1348_v63  ;;  %v1667_v23 = vand.u32 2147483647, %v1507_v2 }
  0xf3   : > { %v712_v29 = vsub.f32 %v392_v14, %v552_v15  ;;  %v871_v40 = vmul.f32 %v711_v19, %v711_v19  ;;  %v1189_v8 = vld [vmem:[%s2682_s23 + $0x178] sm:$0xff]  ;;  %v1350_v19 = vld [vmem:[%s2685_s7 + $0x180] sm:$0xff] }
  0xf4   : > { %v1022_v45 = vadd.f32 %v1021_v35, %v863_v24  ;;  %v393_v24 = vld [vmem:[%s2669_s5 + $0x1c0] sm:$0xff]  ;;  %v1818_v28 = vadd.f32 %v1817_v18, %v1659_v7  ;;  %v554_v35 = vld [vmem:[%s2676_s13 + $0x1c8] sm:$0xff]  ;;  %v1509_v22 = vsub.f32 %v1189_v8, %v1349_v9  ;;  %v1668_v33 = vand.u32 2147483647, %v1508_v12 }
  0xf5   : > { %v713_v39 = vsub.f32 %v393_v24, %v553_v25  ;;  %v872_v50 = vmul.f32 %v712_v29, %v712_v29  ;;  %v1190_v18 = vld [vmem:[%s2682_s23 + $0x180] sm:$0xff]  ;;  %v1351_v29 = vld [vmem:[%s2685_s7 + $0x188] sm:$0xff] }
  0xf6   : > { %v1023_v55 = vadd.f32 %v1022_v45, %v864_v34  ;;  %v394_v34 = vld [vmem:[%s2669_s5 + $0x1c8] sm:$0xff]  ;;  %v1819_v38 = vadd.f32 %v1818_v28, %v1660_v17  ;;  %v555_v45 = vld [vmem:[%s2676_s13 + $0x1d0] sm:$0xff]  ;;  %v1510_v32 = vsub.f32 %v1190_v18, %v1350_v19  ;;  %v1669_v43 = vand.u32 2147483647, %v1509_v22 }
  0xf7   : > { %v714_v49 = vsub.f32 %v394_v34, %v554_v35  ;;  %v873_v60 = vmul.f32 %v713_v39, %v713_v39  ;;  %v1191_v28 = vld [vmem:[%s2682_s23 + $0x188] sm:$0xff]  ;;  %v1352_v39 = vld [vmem:[%s2685_s7 + $0x190] sm:$0xff] }
  0xf8   : > { %v1024_v1 = vadd.f32 %v1023_v55, %v865_v44  ;;  %v395_v44 = vld [vmem:[%s2669_s5 + $0x1d0] sm:$0xff]  ;;  %v1820_v48 = vadd.f32 %v1819_v38, %v1661_v27  ;;  %v556_v55 = vld [vmem:[%s2676_s13 + $0x1d8] sm:$0xff]  ;;  %v1511_v42 = vsub.f32 %v1191_v28, %v1351_v29  ;;  %v1670_v53 = vand.u32 2147483647, %v1510_v32 }
  0xf9   : > { %v715_v59 = vsub.f32 %v395_v44, %v555_v45  ;;  %v874_v6 = vmul.f32 %v714_v49, %v714_v49  ;;  %v1192_v38 = vld [vmem:[%s2682_s23 + $0x190] sm:$0xff]  ;;  %v1353_v49 = vld [vmem:[%s2685_s7 + $0x198] sm:$0xff] }
  0xfa   : > { %v1025_v11 = vadd.f32 %v1024_v1, %v866_v54  ;;  %v396_v54 = vld [vmem:[%s2669_s5 + $0x1d8] sm:$0xff]  ;;  %v1821_v58 = vadd.f32 %v1820_v48, %v1662_v37  ;;  %v557_v1 = vld [vmem:[%s2676_s13 + $0x1e0] sm:$0xff]  ;;  %v1512_v52 = vsub.f32 %v1192_v38, %v1352_v39  ;;  %v1671_v63 = vand.u32 2147483647, %v1511_v42 }
  0xfb   : > { %v716_v5 = vsub.f32 %v396_v54, %v556_v55  ;;  %v875_v16 = vmul.f32 %v715_v59, %v715_v59  ;;  %v1193_v48 = vld [vmem:[%s2682_s23 + $0x198] sm:$0xff]  ;;  %v1354_v59 = vld [vmem:[%s2685_s7 + $0x1a0] sm:$0xff] }
  0xfc   : > { %v1026_v21 = vadd.f32 %v1025_v11, %v867_v0  ;;  %v397_v0 = vld [vmem:[%s2669_s5 + $0x1e0] sm:$0xff]  ;;  %v1822_v4 = vadd.f32 %v1821_v58, %v1663_v47  ;;  %v558_v11 = vld [vmem:[%s2676_s13 + $0x1e8] sm:$0xff]  ;;  %v1513_v62 = vsub.f32 %v1193_v48, %v1353_v49  ;;  %v1672_v9 = vand.u32 2147483647, %v1512_v52 }
  0xfd   : > { %v717_v15 = vsub.f32 %v397_v0, %v557_v1  ;;  %v876_v26 = vmul.f32 %v716_v5, %v716_v5  ;;  %v1194_v58 = vld [vmem:[%s2682_s23 + $0x1a0] sm:$0xff]  ;;  %v1355_v5 = vld [vmem:[%s2685_s7 + $0x1a8] sm:$0xff] }
  0xfe   : > { %v1027_v31 = vadd.f32 %v1026_v21, %v868_v10  ;;  %v398_v10 = vld [vmem:[%s2669_s5 + $0x1e8] sm:$0xff]  ;;  %v1823_v14 = vadd.f32 %v1822_v4, %v1664_v57  ;;  %v559_v21 = vld [vmem:[%s2676_s13 + $0x1f0] sm:$0xff]  ;;  %v1514_v8 = vsub.f32 %v1194_v58, %v1354_v59  ;;  %v1673_v19 = vand.u32 2147483647, %v1513_v62 }
  0xff   : > { %v718_v25 = vsub.f32 %v398_v10, %v558_v11  ;;  %v877_v36 = vmul.f32 %v717_v15, %v717_v15  ;;  %v1195_v4 = vld [vmem:[%s2682_s23 + $0x1a8] sm:$0xff]  ;;  %v1356_v15 = vld [vmem:[%s2685_s7 + $0x1b0] sm:$0xff] }
 0x100   : > { %v1028_v41 = vadd.f32 %v1027_v31, %v869_v20  ;;  %v399_v20 = vld [vmem:[%s2669_s5 + $0x1f0] sm:$0xff]  ;;  %v1824_v24 = vadd.f32 %v1823_v14, %v1665_v3  ;;  %v560_v31 = vld [vmem:[%s2676_s13 + $0x1f8] sm:$0xff]  ;;  %v1515_v18 = vsub.f32 %v1195_v4, %v1355_v5  ;;  %v1674_v29 = vand.u32 2147483647, %v1514_v8 }
 0x101   : > { %v719_v35 = vsub.f32 %v399_v20, %v559_v21  ;;  %v878_v46 = vmul.f32 %v718_v25, %v718_v25  ;;  %v1196_v14 = vld [vmem:[%s2682_s23 + $0x1b0] sm:$0xff]  ;;  %v1357_v25 = vld [vmem:[%s2685_s7 + $0x1b8] sm:$0xff] }
 0x102   : > { %v1029_v51 = vadd.f32 %v1028_v41, %v870_v30  ;;  %v400_v30 = vld [vmem:[%s2669_s5 + $0x1f8] sm:$0xff]  ;;  %v1825_v34 = vadd.f32 %v1824_v24, %v1666_v13  ;;  %v561_v41 = vld [vmem:[%s2676_s13 + $0x200] sm:$0xff]  ;;  %v1516_v28 = vsub.f32 %v1196_v14, %v1356_v15  ;;  %v1675_v39 = vand.u32 2147483647, %v1515_v18 }
 0x103   : > { %v720_v45 = vsub.f32 %v400_v30, %v560_v31  ;;  %v879_v56 = vmul.f32 %v719_v35, %v719_v35  ;;  %v1197_v24 = vld [vmem:[%s2682_s23 + $0x1b8] sm:$0xff]  ;;  %v1358_v35 = vld [vmem:[%s2685_s7 + $0x1c0] sm:$0xff] }
 0x104   : > { %v1030_v61 = vadd.f32 %v1029_v51, %v871_v40  ;;  %v401_v40 = vld [vmem:[%s2669_s5 + $0x200] sm:$0xff]  ;;  %v1826_v44 = vadd.f32 %v1825_v34, %v1667_v23  ;;  %v562_v51 = vld [vmem:[%s2676_s13 + $0x208] sm:$0xff]  ;;  %v1517_v38 = vsub.f32 %v1197_v24, %v1357_v25  ;;  %v1676_v49 = vand.u32 2147483647, %v1516_v28 }
 0x105   : > { %v721_v55 = vsub.f32 %v401_v40, %v561_v41  ;;  %v880_v2 = vmul.f32 %v720_v45, %v720_v45  ;;  %v1198_v34 = vld [vmem:[%s2682_s23 + $0x1c0] sm:$0xff]  ;;  %v1359_v45 = vld [vmem:[%s2685_s7 + $0x1c8] sm:$0xff] }
 0x106   : > { %v1031_v7 = vadd.f32 %v1030_v61, %v872_v50  ;;  %v402_v50 = vld [vmem:[%s2669_s5 + $0x208] sm:$0xff]  ;;  %v1827_v54 = vadd.f32 %v1826_v44, %v1668_v33  ;;  %v563_v61 = vld [vmem:[%s2676_s13 + $0x210] sm:$0xff]  ;;  %v1518_v48 = vsub.f32 %v1198_v34, %v1358_v35  ;;  %v1677_v59 = vand.u32 2147483647, %v1517_v38 }
 0x107   : > { %v722_v1 = vsub.f32 %v402_v50, %v562_v51  ;;  %v881_v12 = vmul.f32 %v721_v55, %v721_v55  ;;  %v1199_v44 = vld [vmem:[%s2682_s23 + $0x1c8] sm:$0xff]  ;;  %v1360_v55 = vld [vmem:[%s2685_s7 + $0x1d0] sm:$0xff] }
 0x108   : > { %v1032_v17 = vadd.f32 %v1031_v7, %v873_v60  ;;  %v403_v60 = vld [vmem:[%s2669_s5 + $0x210] sm:$0xff]  ;;  %v1828_v0 = vadd.f32 %v1827_v54, %v1669_v43  ;;  %v564_v7 = vld [vmem:[%s2676_s13 + $0x218] sm:$0xff]  ;;  %v1519_v58 = vsub.f32 %v1199_v44, %v1359_v45  ;;  %v1678_v5 = vand.u32 2147483647, %v1518_v48 }
 0x109   : > { %v723_v11 = vsub.f32 %v403_v60, %v563_v61  ;;  %v882_v22 = vmul.f32 %v722_v1, %v722_v1  ;;  %v1200_v54 = vld [vmem:[%s2682_s23 + $0x1d0] sm:$0xff]  ;;  %v1361_v1 = vld [vmem:[%s2685_s7 + $0x1d8] sm:$0xff] }
 0x10a   : > { %v1033_v27 = vadd.f32 %v1032_v17, %v874_v6  ;;  %v404_v6 = vld [vmem:[%s2669_s5 + $0x218] sm:$0xff]  ;;  %v1829_v10 = vadd.f32 %v1828_v0, %v1670_v53  ;;  %v565_v17 = vld [vmem:[%s2676_s13 + $0x220] sm:$0xff]  ;;  %v1520_v4 = vsub.f32 %v1200_v54, %v1360_v55  ;;  %v1679_v15 = vand.u32 2147483647, %v1519_v58 }
 0x10b   : > { %v724_v21 = vsub.f32 %v404_v6, %v564_v7  ;;  %v883_v32 = vmul.f32 %v723_v11, %v723_v11  ;;  %v1201_v0 = vld [vmem:[%s2682_s23 + $0x1d8] sm:$0xff]  ;;  %v1362_v11 = vld [vmem:[%s2685_s7 + $0x1e0] sm:$0xff] }
 0x10c   : > { %v1034_v37 = vadd.f32 %v1033_v27, %v875_v16  ;;  %v405_v16 = vld [vmem:[%s2669_s5 + $0x220] sm:$0xff]  ;;  %v1830_v20 = vadd.f32 %v1829_v10, %v1671_v63  ;;  %v566_v27 = vld [vmem:[%s2676_s13 + $0x228] sm:$0xff]  ;;  %v1521_v14 = vsub.f32 %v1201_v0, %v1361_v1  ;;  %v1680_v25 = vand.u32 2147483647, %v1520_v4 }
 0x10d   : > { %v725_v31 = vsub.f32 %v405_v16, %v565_v17  ;;  %v884_v42 = vmul.f32 %v724_v21, %v724_v21  ;;  %v1202_v10 = vld [vmem:[%s2682_s23 + $0x1e0] sm:$0xff]  ;;  %v1363_v21 = vld [vmem:[%s2685_s7 + $0x1e8] sm:$0xff] }
 0x10e   : > { %v1035_v47 = vadd.f32 %v1034_v37, %v876_v26  ;;  %v406_v26 = vld [vmem:[%s2669_s5 + $0x228] sm:$0xff]  ;;  %v1831_v30 = vadd.f32 %v1830_v20, %v1672_v9  ;;  %v567_v37 = vld [vmem:[%s2676_s13 + $0x230] sm:$0xff]  ;;  %v1522_v24 = vsub.f32 %v1202_v10, %v1362_v11  ;;  %v1681_v35 = vand.u32 2147483647, %v1521_v14 }
 0x10f   : > { %v726_v41 = vsub.f32 %v406_v26, %v566_v27  ;;  %v885_v52 = vmul.f32 %v725_v31, %v725_v31  ;;  %v1203_v20 = vld [vmem:[%s2682_s23 + $0x1e8] sm:$0xff]  ;;  %v1364_v31 = vld [vmem:[%s2685_s7 + $0x1f0] sm:$0xff] }
 0x110   : > { %v1036_v57 = vadd.f32 %v1035_v47, %v877_v36  ;;  %v407_v36 = vld [vmem:[%s2669_s5 + $0x230] sm:$0xff]  ;;  %v1832_v40 = vadd.f32 %v1831_v30, %v1673_v19  ;;  %v568_v47 = vld [vmem:[%s2676_s13 + $0x238] sm:$0xff]  ;;  %v1523_v34 = vsub.f32 %v1203_v20, %v1363_v21  ;;  %v1682_v45 = vand.u32 2147483647, %v1522_v24 }
 0x111   : > { %v727_v51 = vsub.f32 %v407_v36, %v567_v37  ;;  %v886_v62 = vmul.f32 %v726_v41, %v726_v41  ;;  %v1204_v30 = vld [vmem:[%s2682_s23 + $0x1f0] sm:$0xff]  ;;  %v1365_v41 = vld [vmem:[%s2685_s7 + $0x1f8] sm:$0xff] }
 0x112   : > { %v1037_v3 = vadd.f32 %v1036_v57, %v878_v46  ;;  %v408_v46 = vld [vmem:[%s2669_s5 + $0x238] sm:$0xff]  ;;  %v1833_v50 = vadd.f32 %v1832_v40, %v1674_v29  ;;  %v569_v57 = vld [vmem:[%s2676_s13 + $0x240] sm:$0xff]  ;;  %v1524_v44 = vsub.f32 %v1204_v30, %v1364_v31  ;;  %v1683_v55 = vand.u32 2147483647, %v1523_v34 }
 0x113   : > { %v728_v61 = vsub.f32 %v408_v46, %v568_v47  ;;  %v887_v8 = vmul.f32 %v727_v51, %v727_v51  ;;  %v1205_v40 = vld [vmem:[%s2682_s23 + $0x1f8] sm:$0xff]  ;;  %v1366_v51 = vld [vmem:[%s2685_s7 + $0x200] sm:$0xff] }
 0x114   : > { %v1038_v13 = vadd.f32 %v1037_v3, %v879_v56  ;;  %v409_v56 = vld [vmem:[%s2669_s5 + $0x240] sm:$0xff]  ;;  %v1834_v60 = vadd.f32 %v1833_v50, %v1675_v39  ;;  %v570_v3 = vld [vmem:[%s2676_s13 + $0x248] sm:$0xff]  ;;  %v1525_v54 = vsub.f32 %v1205_v40, %v1365_v41  ;;  %v1684_v1 = vand.u32 2147483647, %v1524_v44 }
 0x115   : > { %v729_v7 = vsub.f32 %v409_v56, %v569_v57  ;;  %v888_v18 = vmul.f32 %v728_v61, %v728_v61  ;;  %v1206_v50 = vld [vmem:[%s2682_s23 + $0x200] sm:$0xff]  ;;  %v1367_v61 = vld [vmem:[%s2685_s7 + $0x208] sm:$0xff] }
 0x116   : > { %v1039_v23 = vadd.f32 %v1038_v13, %v880_v2  ;;  %v410_v2 = vld [vmem:[%s2669_s5 + $0x248] sm:$0xff]  ;;  %v1835_v6 = vadd.f32 %v1834_v60, %v1676_v49  ;;  %v571_v13 = vld [vmem:[%s2676_s13 + $0x250] sm:$0xff]  ;;  %v1526_v0 = vsub.f32 %v1206_v50, %v1366_v51  ;;  %v1685_v11 = vand.u32 2147483647, %v1525_v54 }
 0x117   : > { %v730_v17 = vsub.f32 %v410_v2, %v570_v3  ;;  %v889_v28 = vmul.f32 %v729_v7, %v729_v7  ;;  %v1207_v60 = vld [vmem:[%s2682_s23 + $0x208] sm:$0xff]  ;;  %v1368_v7 = vld [vmem:[%s2685_s7 + $0x210] sm:$0xff] }
 0x118   : > { %v1040_v33 = vadd.f32 %v1039_v23, %v881_v12  ;;  %v411_v12 = vld [vmem:[%s2669_s5 + $0x250] sm:$0xff]  ;;  %v1836_v16 = vadd.f32 %v1835_v6, %v1677_v59  ;;  %v572_v23 = vld [vmem:[%s2676_s13 + $0x258] sm:$0xff]  ;;  %v1527_v10 = vsub.f32 %v1207_v60, %v1367_v61  ;;  %v1686_v21 = vand.u32 2147483647, %v1526_v0 }
 0x119   : > { %v731_v27 = vsub.f32 %v411_v12, %v571_v13  ;;  %v890_v38 = vmul.f32 %v730_v17, %v730_v17  ;;  %v1208_v6 = vld [vmem:[%s2682_s23 + $0x210] sm:$0xff]  ;;  %v1369_v17 = vld [vmem:[%s2685_s7 + $0x218] sm:$0xff] }
 0x11a   : > { %v1041_v43 = vadd.f32 %v1040_v33, %v882_v22  ;;  %v412_v22 = vld [vmem:[%s2669_s5 + $0x258] sm:$0xff]  ;;  %v1837_v26 = vadd.f32 %v1836_v16, %v1678_v5  ;;  %v573_v33 = vld [vmem:[%s2676_s13 + $0x260] sm:$0xff]  ;;  %v1528_v20 = vsub.f32 %v1208_v6, %v1368_v7  ;;  %v1687_v31 = vand.u32 2147483647, %v1527_v10 }
 0x11b   : > { %v732_v37 = vsub.f32 %v412_v22, %v572_v23  ;;  %v891_v48 = vmul.f32 %v731_v27, %v731_v27  ;;  %v1209_v16 = vld [vmem:[%s2682_s23 + $0x218] sm:$0xff]  ;;  %v1370_v27 = vld [vmem:[%s2685_s7 + $0x220] sm:$0xff] }
 0x11c   : > { %v1042_v53 = vadd.f32 %v1041_v43, %v883_v32  ;;  %v413_v32 = vld [vmem:[%s2669_s5 + $0x260] sm:$0xff]  ;;  %v1838_v36 = vadd.f32 %v1837_v26, %v1679_v15  ;;  %v574_v43 = vld [vmem:[%s2676_s13 + $0x268] sm:$0xff]  ;;  %v1529_v30 = vsub.f32 %v1209_v16, %v1369_v17  ;;  %v1688_v41 = vand.u32 2147483647, %v1528_v20 }
 0x11d   : > { %v733_v47 = vsub.f32 %v413_v32, %v573_v33  ;;  %v892_v58 = vmul.f32 %v732_v37, %v732_v37  ;;  %v1210_v26 = vld [vmem:[%s2682_s23 + $0x220] sm:$0xff]  ;;  %v1371_v37 = vld [vmem:[%s2685_s7 + $0x228] sm:$0xff] }
 0x11e   : > { %v1043_v63 = vadd.f32 %v1042_v53, %v884_v42  ;;  %v414_v42 = vld [vmem:[%s2669_s5 + $0x268] sm:$0xff]  ;;  %v1839_v46 = vadd.f32 %v1838_v36, %v1680_v25  ;;  %v575_v53 = vld [vmem:[%s2676_s13 + $0x270] sm:$0xff]  ;;  %v1530_v40 = vsub.f32 %v1210_v26, %v1370_v27  ;;  %v1689_v51 = vand.u32 2147483647, %v1529_v30 }
 0x11f   : > { %v734_v57 = vsub.f32 %v414_v42, %v574_v43  ;;  %v893_v4 = vmul.f32 %v733_v47, %v733_v47  ;;  %v1211_v36 = vld [vmem:[%s2682_s23 + $0x228] sm:$0xff]  ;;  %v1372_v47 = vld [vmem:[%s2685_s7 + $0x230] sm:$0xff] }
 0x120   : > { %v1044_v9 = vadd.f32 %v1043_v63, %v885_v52  ;;  %v415_v52 = vld [vmem:[%s2669_s5 + $0x270] sm:$0xff]  ;;  %v1840_v56 = vadd.f32 %v1839_v46, %v1681_v35  ;;  %v576_v63 = vld [vmem:[%s2676_s13 + $0x278] sm:$0xff]  ;;  %v1531_v50 = vsub.f32 %v1211_v36, %v1371_v37  ;;  %v1690_v61 = vand.u32 2147483647, %v1530_v40 }
 0x121   : > { %v735_v3 = vsub.f32 %v415_v52, %v575_v53  ;;  %v894_v14 = vmul.f32 %v734_v57, %v734_v57  ;;  %v1212_v46 = vld [vmem:[%s2682_s23 + $0x230] sm:$0xff]  ;;  %v1373_v57 = vld [vmem:[%s2685_s7 + $0x238] sm:$0xff] }
 0x122   : > { %v1045_v19 = vadd.f32 %v1044_v9, %v886_v62  ;;  %v416_v62 = vld [vmem:[%s2669_s5 + $0x278] sm:$0xff]  ;;  %v1841_v2 = vadd.f32 %v1840_v56, %v1682_v45  ;;  %v577_v9 = vld [vmem:[%s2676_s13 + $0x280] sm:$0xff]  ;;  %v1532_v60 = vsub.f32 %v1212_v46, %v1372_v47  ;;  %v1691_v7 = vand.u32 2147483647, %v1531_v50 }
 0x123   : > { %v736_v13 = vsub.f32 %v416_v62, %v576_v63  ;;  %v895_v24 = vmul.f32 %v735_v3, %v735_v3  ;;  %v1213_v56 = vld [vmem:[%s2682_s23 + $0x238] sm:$0xff]  ;;  %v1374_v3 = vld [vmem:[%s2685_s7 + $0x240] sm:$0xff] }
 0x124   : > { %v1046_v29 = vadd.f32 %v1045_v19, %v887_v8  ;;  %v417_v8 = vld [vmem:[%s2669_s5 + $0x280] sm:$0xff]  ;;  %v1842_v12 = vadd.f32 %v1841_v2, %v1683_v55  ;;  %v578_v19 = vld [vmem:[%s2676_s13 + $0x288] sm:$0xff]  ;;  %v1533_v6 = vsub.f32 %v1213_v56, %v1373_v57  ;;  %v1692_v17 = vand.u32 2147483647, %v1532_v60 }
 0x125   : > { %v737_v23 = vsub.f32 %v417_v8, %v577_v9  ;;  %v896_v34 = vmul.f32 %v736_v13, %v736_v13  ;;  %v1214_v2 = vld [vmem:[%s2682_s23 + $0x240] sm:$0xff]  ;;  %v1375_v13 = vld [vmem:[%s2685_s7 + $0x248] sm:$0xff] }
 0x126   : > { %v1047_v39 = vadd.f32 %v1046_v29, %v888_v18  ;;  %v418_v18 = vld [vmem:[%s2669_s5 + $0x288] sm:$0xff]  ;;  %v1843_v22 = vadd.f32 %v1842_v12, %v1684_v1  ;;  %v579_v29 = vld [vmem:[%s2676_s13 + $0x290] sm:$0xff]  ;;  %v1534_v16 = vsub.f32 %v1214_v2, %v1374_v3  ;;  %v1693_v27 = vand.u32 2147483647, %v1533_v6 }
 0x127   : > { %v738_v33 = vsub.f32 %v418_v18, %v578_v19  ;;  %v897_v44 = vmul.f32 %v737_v23, %v737_v23  ;;  %v1215_v12 = vld [vmem:[%s2682_s23 + $0x248] sm:$0xff]  ;;  %v1376_v23 = vld [vmem:[%s2685_s7 + $0x250] sm:$0xff] }
 0x128   : > { %v1048_v49 = vadd.f32 %v1047_v39, %v889_v28  ;;  %v419_v28 = vld [vmem:[%s2669_s5 + $0x290] sm:$0xff]  ;;  %v1844_v32 = vadd.f32 %v1843_v22, %v1685_v11  ;;  %v580_v39 = vld [vmem:[%s2676_s13 + $0x298] sm:$0xff]  ;;  %v1535_v26 = vsub.f32 %v1215_v12, %v1375_v13  ;;  %v1694_v37 = vand.u32 2147483647, %v1534_v16 }
 0x129   : > { %v739_v43 = vsub.f32 %v419_v28, %v579_v29  ;;  %v898_v54 = vmul.f32 %v738_v33, %v738_v33  ;;  %v1216_v22 = vld [vmem:[%s2682_s23 + $0x250] sm:$0xff]  ;;  %v1377_v33 = vld [vmem:[%s2685_s7 + $0x258] sm:$0xff] }
 0x12a   : > { %v1049_v59 = vadd.f32 %v1048_v49, %v890_v38  ;;  %v420_v38 = vld [vmem:[%s2669_s5 + $0x298] sm:$0xff]  ;;  %v1845_v42 = vadd.f32 %v1844_v32, %v1686_v21  ;;  %v581_v49 = vld [vmem:[%s2676_s13 + $0x2a0] sm:$0xff]  ;;  %v1536_v36 = vsub.f32 %v1216_v22, %v1376_v23  ;;  %v1695_v47 = vand.u32 2147483647, %v1535_v26 }
 0x12b   : > { %v740_v53 = vsub.f32 %v420_v38, %v580_v39  ;;  %v899_v0 = vmul.f32 %v739_v43, %v739_v43  ;;  %v1217_v32 = vld [vmem:[%s2682_s23 + $0x258] sm:$0xff]  ;;  %v1378_v43 = vld [vmem:[%s2685_s7 + $0x260] sm:$0xff] }
 0x12c   : > { %v1050_v5 = vadd.f32 %v1049_v59, %v891_v48  ;;  %v421_v48 = vld [vmem:[%s2669_s5 + $0x2a0] sm:$0xff]  ;;  %v1846_v52 = vadd.f32 %v1845_v42, %v1687_v31  ;;  %v582_v59 = vld [vmem:[%s2676_s13 + $0x2a8] sm:$0xff]  ;;  %v1537_v46 = vsub.f32 %v1217_v32, %v1377_v33  ;;  %v1696_v57 = vand.u32 2147483647, %v1536_v36 }
 0x12d   : > { %v741_v63 = vsub.f32 %v421_v48, %v581_v49  ;;  %v900_v10 = vmul.f32 %v740_v53, %v740_v53  ;;  %v1218_v42 = vld [vmem:[%s2682_s23 + $0x260] sm:$0xff]  ;;  %v1379_v53 = vld [vmem:[%s2685_s7 + $0x268] sm:$0xff] }
 0x12e   : > { %v1051_v15 = vadd.f32 %v1050_v5, %v892_v58  ;;  %v422_v58 = vld [vmem:[%s2669_s5 + $0x2a8] sm:$0xff]  ;;  %v1847_v62 = vadd.f32 %v1846_v52, %v1688_v41  ;;  %v583_v5 = vld [vmem:[%s2676_s13 + $0x2b0] sm:$0xff]  ;;  %v1538_v56 = vsub.f32 %v1218_v42, %v1378_v43  ;;  %v1697_v3 = vand.u32 2147483647, %v1537_v46 }
 0x12f   : > { %v742_v9 = vsub.f32 %v422_v58, %v582_v59  ;;  %v901_v20 = vmul.f32 %v741_v63, %v741_v63  ;;  %v1219_v52 = vld [vmem:[%s2682_s23 + $0x268] sm:$0xff]  ;;  %v1380_v63 = vld [vmem:[%s2685_s7 + $0x270] sm:$0xff] }
 0x130   : > { %v1052_v25 = vadd.f32 %v1051_v15, %v893_v4  ;;  %v423_v4 = vld [vmem:[%s2669_s5 + $0x2b0] sm:$0xff]  ;;  %v1848_v8 = vadd.f32 %v1847_v62, %v1689_v51  ;;  %v584_v15 = vld [vmem:[%s2676_s13 + $0x2b8] sm:$0xff]  ;;  %v1539_v2 = vsub.f32 %v1219_v52, %v1379_v53  ;;  %v1698_v13 = vand.u32 2147483647, %v1538_v56 }
 0x131   : > { %v743_v19 = vsub.f32 %v423_v4, %v583_v5  ;;  %v902_v30 = vmul.f32 %v742_v9, %v742_v9  ;;  %v1220_v62 = vld [vmem:[%s2682_s23 + $0x270] sm:$0xff]  ;;  %v1381_v9 = vld [vmem:[%s2685_s7 + $0x278] sm:$0xff] }
 0x132   : > { %v1053_v35 = vadd.f32 %v1052_v25, %v894_v14  ;;  %v424_v14 = vld [vmem:[%s2669_s5 + $0x2b8] sm:$0xff]  ;;  %v1849_v18 = vadd.f32 %v1848_v8, %v1690_v61  ;;  %v585_v25 = vld [vmem:[%s2676_s13 + $0x2c0] sm:$0xff]  ;;  %v1540_v12 = vsub.f32 %v1220_v62, %v1380_v63  ;;  %v1699_v23 = vand.u32 2147483647, %v1539_v2 }
 0x133   : > { %v744_v29 = vsub.f32 %v424_v14, %v584_v15  ;;  %v903_v40 = vmul.f32 %v743_v19, %v743_v19  ;;  %v1221_v8 = vld [vmem:[%s2682_s23 + $0x278] sm:$0xff]  ;;  %v1382_v19 = vld [vmem:[%s2685_s7 + $0x280] sm:$0xff] }
 0x134   : > { %v1054_v45 = vadd.f32 %v1053_v35, %v895_v24  ;;  %v425_v24 = vld [vmem:[%s2669_s5 + $0x2c0] sm:$0xff]  ;;  %v1850_v28 = vadd.f32 %v1849_v18, %v1691_v7  ;;  %v586_v35 = vld [vmem:[%s2676_s13 + $0x2c8] sm:$0xff]  ;;  %v1541_v22 = vsub.f32 %v1221_v8, %v1381_v9  ;;  %v1700_v33 = vand.u32 2147483647, %v1540_v12 }
 0x135   : > { %v745_v39 = vsub.f32 %v425_v24, %v585_v25  ;;  %v904_v50 = vmul.f32 %v744_v29, %v744_v29  ;;  %v1222_v18 = vld [vmem:[%s2682_s23 + $0x280] sm:$0xff]  ;;  %v1383_v29 = vld [vmem:[%s2685_s7 + $0x288] sm:$0xff] }
 0x136   : > { %v1055_v55 = vadd.f32 %v1054_v45, %v896_v34  ;;  %v426_v34 = vld [vmem:[%s2669_s5 + $0x2c8] sm:$0xff]  ;;  %v1851_v38 = vadd.f32 %v1850_v28, %v1692_v17  ;;  %v587_v45 = vld [vmem:[%s2676_s13 + $0x2d0] sm:$0xff]  ;;  %v1542_v32 = vsub.f32 %v1222_v18, %v1382_v19  ;;  %v1701_v43 = vand.u32 2147483647, %v1541_v22 }
 0x137   : > { %v746_v49 = vsub.f32 %v426_v34, %v586_v35  ;;  %v905_v60 = vmul.f32 %v745_v39, %v745_v39  ;;  %v1223_v28 = vld [vmem:[%s2682_s23 + $0x288] sm:$0xff]  ;;  %v1384_v39 = vld [vmem:[%s2685_s7 + $0x290] sm:$0xff] }
 0x138   : > { %v1056_v1 = vadd.f32 %v1055_v55, %v897_v44  ;;  %v427_v44 = vld [vmem:[%s2669_s5 + $0x2d0] sm:$0xff]  ;;  %v1852_v48 = vadd.f32 %v1851_v38, %v1693_v27  ;;  %v588_v55 = vld [vmem:[%s2676_s13 + $0x2d8] sm:$0xff]  ;;  %v1543_v42 = vsub.f32 %v1223_v28, %v1383_v29  ;;  %v1702_v53 = vand.u32 2147483647, %v1542_v32 }
 0x139   : > { %v747_v59 = vsub.f32 %v427_v44, %v587_v45  ;;  %v906_v6 = vmul.f32 %v746_v49, %v746_v49  ;;  %v1224_v38 = vld [vmem:[%s2682_s23 + $0x290] sm:$0xff]  ;;  %v1385_v49 = vld [vmem:[%s2685_s7 + $0x298] sm:$0xff] }
 0x13a   : > { %v1057_v11 = vadd.f32 %v1056_v1, %v898_v54  ;;  %v428_v54 = vld [vmem:[%s2669_s5 + $0x2d8] sm:$0xff]  ;;  %v1853_v58 = vadd.f32 %v1852_v48, %v1694_v37  ;;  %v589_v1 = vld [vmem:[%s2676_s13 + $0x2e0] sm:$0xff]  ;;  %v1544_v52 = vsub.f32 %v1224_v38, %v1384_v39  ;;  %v1703_v63 = vand.u32 2147483647, %v1543_v42 }
 0x13b   : > { %v748_v5 = vsub.f32 %v428_v54, %v588_v55  ;;  %v907_v16 = vmul.f32 %v747_v59, %v747_v59  ;;  %v1225_v48 = vld [vmem:[%s2682_s23 + $0x298] sm:$0xff]  ;;  %v1386_v59 = vld [vmem:[%s2685_s7 + $0x2a0] sm:$0xff] }
 0x13c   : > { %v1058_v21 = vadd.f32 %v1057_v11, %v899_v0  ;;  %v429_v0 = vld [vmem:[%s2669_s5 + $0x2e0] sm:$0xff]  ;;  %v1854_v4 = vadd.f32 %v1853_v58, %v1695_v47  ;;  %v590_v11 = vld [vmem:[%s2676_s13 + $0x2e8] sm:$0xff]  ;;  %v1545_v62 = vsub.f32 %v1225_v48, %v1385_v49  ;;  %v1704_v9 = vand.u32 2147483647, %v1544_v52 }
 0x13d   : > { %v749_v15 = vsub.f32 %v429_v0, %v589_v1  ;;  %v908_v26 = vmul.f32 %v748_v5, %v748_v5  ;;  %v1226_v58 = vld [vmem:[%s2682_s23 + $0x2a0] sm:$0xff]  ;;  %v1387_v5 = vld [vmem:[%s2685_s7 + $0x2a8] sm:$0xff] }
 0x13e   : > { %v1059_v31 = vadd.f32 %v1058_v21, %v900_v10  ;;  %v430_v10 = vld [vmem:[%s2669_s5 + $0x2e8] sm:$0xff]  ;;  %v1855_v14 = vadd.f32 %v1854_v4, %v1696_v57  ;;  %v591_v21 = vld [vmem:[%s2676_s13 + $0x2f0] sm:$0xff]  ;;  %v1546_v8 = vsub.f32 %v1226_v58, %v1386_v59  ;;  %v1705_v19 = vand.u32 2147483647, %v1545_v62 }
 0x13f   : > { %v750_v25 = vsub.f32 %v430_v10, %v590_v11  ;;  %v909_v36 = vmul.f32 %v749_v15, %v749_v15  ;;  %v1227_v4 = vld [vmem:[%s2682_s23 + $0x2a8] sm:$0xff]  ;;  %v1388_v15 = vld [vmem:[%s2685_s7 + $0x2b0] sm:$0xff] }
 0x140   : > { %v1060_v41 = vadd.f32 %v1059_v31, %v901_v20  ;;  %v431_v20 = vld [vmem:[%s2669_s5 + $0x2f0] sm:$0xff]  ;;  %v1856_v24 = vadd.f32 %v1855_v14, %v1697_v3  ;;  %v592_v31 = vld [vmem:[%s2676_s13 + $0x2f8] sm:$0xff]  ;;  %v1547_v18 = vsub.f32 %v1227_v4, %v1387_v5  ;;  %v1706_v29 = vand.u32 2147483647, %v1546_v8 }
 0x141   : > { %v751_v35 = vsub.f32 %v431_v20, %v591_v21  ;;  %v910_v46 = vmul.f32 %v750_v25, %v750_v25  ;;  %v1228_v14 = vld [vmem:[%s2682_s23 + $0x2b0] sm:$0xff]  ;;  %v1389_v25 = vld [vmem:[%s2685_s7 + $0x2b8] sm:$0xff] }
 0x142   : > { %v1061_v51 = vadd.f32 %v1060_v41, %v902_v30  ;;  %v432_v30 = vld [vmem:[%s2669_s5 + $0x2f8] sm:$0xff]  ;;  %v1857_v34 = vadd.f32 %v1856_v24, %v1698_v13  ;;  %v593_v41 = vld [vmem:[%s2676_s13 + $0x300] sm:$0xff]  ;;  %v1548_v28 = vsub.f32 %v1228_v14, %v1388_v15  ;;  %v1707_v39 = vand.u32 2147483647, %v1547_v18 }
 0x143   : > { %v752_v45 = vsub.f32 %v432_v30, %v592_v31  ;;  %v911_v56 = vmul.f32 %v751_v35, %v751_v35  ;;  %v1229_v24 = vld [vmem:[%s2682_s23 + $0x2b8] sm:$0xff]  ;;  %v1390_v35 = vld [vmem:[%s2685_s7 + $0x2c0] sm:$0xff] }
 0x144   : > { %v1062_v61 = vadd.f32 %v1061_v51, %v903_v40  ;;  %v433_v40 = vld [vmem:[%s2669_s5 + $0x300] sm:$0xff]  ;;  %v1858_v44 = vadd.f32 %v1857_v34, %v1699_v23  ;;  %v594_v51 = vld [vmem:[%s2676_s13 + $0x308] sm:$0xff]  ;;  %v1549_v38 = vsub.f32 %v1229_v24, %v1389_v25  ;;  %v1708_v49 = vand.u32 2147483647, %v1548_v28 }
 0x145   : > { %v753_v55 = vsub.f32 %v433_v40, %v593_v41  ;;  %v912_v2 = vmul.f32 %v752_v45, %v752_v45  ;;  %v1230_v34 = vld [vmem:[%s2682_s23 + $0x2c0] sm:$0xff]  ;;  %v1391_v45 = vld [vmem:[%s2685_s7 + $0x2c8] sm:$0xff] }
 0x146   : > { %v1063_v7 = vadd.f32 %v1062_v61, %v904_v50  ;;  %v434_v50 = vld [vmem:[%s2669_s5 + $0x308] sm:$0xff]  ;;  %v1859_v54 = vadd.f32 %v1858_v44, %v1700_v33  ;;  %v595_v61 = vld [vmem:[%s2676_s13 + $0x310] sm:$0xff]  ;;  %v1550_v48 = vsub.f32 %v1230_v34, %v1390_v35  ;;  %v1709_v59 = vand.u32 2147483647, %v1549_v38 }
 0x147   : > { %v754_v1 = vsub.f32 %v434_v50, %v594_v51  ;;  %v913_v12 = vmul.f32 %v753_v55, %v753_v55  ;;  %v1231_v44 = vld [vmem:[%s2682_s23 + $0x2c8] sm:$0xff]  ;;  %v1392_v55 = vld [vmem:[%s2685_s7 + $0x2d0] sm:$0xff] }
 0x148   : > { %v1064_v17 = vadd.f32 %v1063_v7, %v905_v60  ;;  %v435_v60 = vld [vmem:[%s2669_s5 + $0x310] sm:$0xff]  ;;  %v1860_v0 = vadd.f32 %v1859_v54, %v1701_v43  ;;  %v596_v7 = vld [vmem:[%s2676_s13 + $0x318] sm:$0xff]  ;;  %v1551_v58 = vsub.f32 %v1231_v44, %v1391_v45  ;;  %v1710_v5 = vand.u32 2147483647, %v1550_v48 }
 0x149   : > { %v755_v11 = vsub.f32 %v435_v60, %v595_v61  ;;  %v914_v22 = vmul.f32 %v754_v1, %v754_v1  ;;  %v1232_v54 = vld [vmem:[%s2682_s23 + $0x2d0] sm:$0xff]  ;;  %v1393_v1 = vld [vmem:[%s2685_s7 + $0x2d8] sm:$0xff] }
 0x14a   : > { %v1065_v27 = vadd.f32 %v1064_v17, %v906_v6  ;;  %v436_v6 = vld [vmem:[%s2669_s5 + $0x318] sm:$0xff]  ;;  %v1861_v10 = vadd.f32 %v1860_v0, %v1702_v53  ;;  %v597_v17 = vld [vmem:[%s2676_s13 + $0x320] sm:$0xff]  ;;  %v1552_v4 = vsub.f32 %v1232_v54, %v1392_v55  ;;  %v1711_v15 = vand.u32 2147483647, %v1551_v58 }
 0x14b   : > { %v756_v21 = vsub.f32 %v436_v6, %v596_v7  ;;  %v915_v32 = vmul.f32 %v755_v11, %v755_v11  ;;  %v1233_v0 = vld [vmem:[%s2682_s23 + $0x2d8] sm:$0xff]  ;;  %v1394_v11 = vld [vmem:[%s2685_s7 + $0x2e0] sm:$0xff] }
 0x14c   : > { %v1066_v37 = vadd.f32 %v1065_v27, %v907_v16  ;;  %v437_v16 = vld [vmem:[%s2669_s5 + $0x320] sm:$0xff]  ;;  %v1862_v20 = vadd.f32 %v1861_v10, %v1703_v63  ;;  %v598_v27 = vld [vmem:[%s2676_s13 + $0x328] sm:$0xff]  ;;  %v1553_v14 = vsub.f32 %v1233_v0, %v1393_v1  ;;  %v1712_v25 = vand.u32 2147483647, %v1552_v4 }
 0x14d   : > { %v757_v31 = vsub.f32 %v437_v16, %v597_v17  ;;  %v916_v42 = vmul.f32 %v756_v21, %v756_v21  ;;  %v1234_v10 = vld [vmem:[%s2682_s23 + $0x2e0] sm:$0xff]  ;;  %v1395_v21 = vld [vmem:[%s2685_s7 + $0x2e8] sm:$0xff] }
 0x14e   : > { %v1067_v47 = vadd.f32 %v1066_v37, %v908_v26  ;;  %v438_v26 = vld [vmem:[%s2669_s5 + $0x328] sm:$0xff]  ;;  %v1863_v30 = vadd.f32 %v1862_v20, %v1704_v9  ;;  %v599_v37 = vld [vmem:[%s2676_s13 + $0x330] sm:$0xff]  ;;  %v1554_v24 = vsub.f32 %v1234_v10, %v1394_v11  ;;  %v1713_v35 = vand.u32 2147483647, %v1553_v14 }
 0x14f   : > { %v758_v41 = vsub.f32 %v438_v26, %v598_v27  ;;  %v917_v52 = vmul.f32 %v757_v31, %v757_v31  ;;  %v1235_v20 = vld [vmem:[%s2682_s23 + $0x2e8] sm:$0xff]  ;;  %v1396_v31 = vld [vmem:[%s2685_s7 + $0x2f0] sm:$0xff] }
 0x150   : > { %v1068_v57 = vadd.f32 %v1067_v47, %v909_v36  ;;  %v439_v36 = vld [vmem:[%s2669_s5 + $0x330] sm:$0xff]  ;;  %v1864_v40 = vadd.f32 %v1863_v30, %v1705_v19  ;;  %v600_v47 = vld [vmem:[%s2676_s13 + $0x338] sm:$0xff]  ;;  %v1555_v34 = vsub.f32 %v1235_v20, %v1395_v21  ;;  %v1714_v45 = vand.u32 2147483647, %v1554_v24 }
 0x151   : > { %v759_v51 = vsub.f32 %v439_v36, %v599_v37  ;;  %v918_v62 = vmul.f32 %v758_v41, %v758_v41  ;;  %v1236_v30 = vld [vmem:[%s2682_s23 + $0x2f0] sm:$0xff]  ;;  %v1397_v41 = vld [vmem:[%s2685_s7 + $0x2f8] sm:$0xff] }
 0x152   : > { %v1069_v3 = vadd.f32 %v1068_v57, %v910_v46  ;;  %v440_v46 = vld [vmem:[%s2669_s5 + $0x338] sm:$0xff]  ;;  %v1865_v50 = vadd.f32 %v1864_v40, %v1706_v29  ;;  %v601_v57 = vld [vmem:[%s2676_s13 + $0x340] sm:$0xff]  ;;  %v1556_v44 = vsub.f32 %v1236_v30, %v1396_v31  ;;  %v1715_v55 = vand.u32 2147483647, %v1555_v34 }
 0x153   : > { %v760_v61 = vsub.f32 %v440_v46, %v600_v47  ;;  %v919_v8 = vmul.f32 %v759_v51, %v759_v51  ;;  %v1237_v40 = vld [vmem:[%s2682_s23 + $0x2f8] sm:$0xff]  ;;  %v1398_v51 = vld [vmem:[%s2685_s7 + $0x300] sm:$0xff] }
 0x154   : > { %v1070_v13 = vadd.f32 %v1069_v3, %v911_v56  ;;  %v441_v56 = vld [vmem:[%s2669_s5 + $0x340] sm:$0xff]  ;;  %v1866_v60 = vadd.f32 %v1865_v50, %v1707_v39  ;;  %v602_v3 = vld [vmem:[%s2676_s13 + $0x348] sm:$0xff]  ;;  %v1557_v54 = vsub.f32 %v1237_v40, %v1397_v41  ;;  %v1716_v1 = vand.u32 2147483647, %v1556_v44 }
 0x155   : > { %v761_v7 = vsub.f32 %v441_v56, %v601_v57  ;;  %v920_v18 = vmul.f32 %v760_v61, %v760_v61  ;;  %v1238_v50 = vld [vmem:[%s2682_s23 + $0x300] sm:$0xff]  ;;  %v1399_v61 = vld [vmem:[%s2685_s7 + $0x308] sm:$0xff] }
 0x156   : > { %v1071_v23 = vadd.f32 %v1070_v13, %v912_v2  ;;  %v442_v2 = vld [vmem:[%s2669_s5 + $0x348] sm:$0xff]  ;;  %v1867_v6 = vadd.f32 %v1866_v60, %v1708_v49  ;;  %v603_v13 = vld [vmem:[%s2676_s13 + $0x350] sm:$0xff]  ;;  %v1558_v0 = vsub.f32 %v1238_v50, %v1398_v51  ;;  %v1717_v11 = vand.u32 2147483647, %v1557_v54 }
 0x157   : > { %v762_v17 = vsub.f32 %v442_v2, %v602_v3  ;;  %v921_v28 = vmul.f32 %v761_v7, %v761_v7  ;;  %v1239_v60 = vld [vmem:[%s2682_s23 + $0x308] sm:$0xff]  ;;  %v1400_v7 = vld [vmem:[%s2685_s7 + $0x310] sm:$0xff] }
 0x158   : > { %v1072_v33 = vadd.f32 %v1071_v23, %v913_v12  ;;  %v443_v12 = vld [vmem:[%s2669_s5 + $0x350] sm:$0xff]  ;;  %v1868_v16 = vadd.f32 %v1867_v6, %v1709_v59  ;;  %v604_v23 = vld [vmem:[%s2676_s13 + $0x358] sm:$0xff]  ;;  %v1559_v10 = vsub.f32 %v1239_v60, %v1399_v61  ;;  %v1718_v21 = vand.u32 2147483647, %v1558_v0 }
 0x159   : > { %v763_v27 = vsub.f32 %v443_v12, %v603_v13  ;;  %v922_v38 = vmul.f32 %v762_v17, %v762_v17  ;;  %v1240_v6 = vld [vmem:[%s2682_s23 + $0x310] sm:$0xff]  ;;  %v1401_v17 = vld [vmem:[%s2685_s7 + $0x318] sm:$0xff] }
 0x15a   : > { %v1073_v43 = vadd.f32 %v1072_v33, %v914_v22  ;;  %v444_v22 = vld [vmem:[%s2669_s5 + $0x358] sm:$0xff]  ;;  %v1869_v26 = vadd.f32 %v1868_v16, %v1710_v5  ;;  %v605_v33 = vld [vmem:[%s2676_s13 + $0x360] sm:$0xff]  ;;  %v1560_v20 = vsub.f32 %v1240_v6, %v1400_v7  ;;  %v1719_v31 = vand.u32 2147483647, %v1559_v10 }
 0x15b   : > { %v764_v37 = vsub.f32 %v444_v22, %v604_v23  ;;  %v923_v48 = vmul.f32 %v763_v27, %v763_v27  ;;  %v1241_v16 = vld [vmem:[%s2682_s23 + $0x318] sm:$0xff]  ;;  %v1402_v27 = vld [vmem:[%s2685_s7 + $0x320] sm:$0xff] }
 0x15c   : > { %v1074_v53 = vadd.f32 %v1073_v43, %v915_v32  ;;  %v445_v32 = vld [vmem:[%s2669_s5 + $0x360] sm:$0xff]  ;;  %v1870_v36 = vadd.f32 %v1869_v26, %v1711_v15  ;;  %v606_v43 = vld [vmem:[%s2676_s13 + $0x368] sm:$0xff]  ;;  %v1561_v30 = vsub.f32 %v1241_v16, %v1401_v17  ;;  %v1720_v41 = vand.u32 2147483647, %v1560_v20 }
 0x15d   : > { %v765_v47 = vsub.f32 %v445_v32, %v605_v33  ;;  %v924_v58 = vmul.f32 %v764_v37, %v764_v37  ;;  %v1242_v26 = vld [vmem:[%s2682_s23 + $0x320] sm:$0xff]  ;;  %v1403_v37 = vld [vmem:[%s2685_s7 + $0x328] sm:$0xff] }
 0x15e   : > { %v1075_v63 = vadd.f32 %v1074_v53, %v916_v42  ;;  %v446_v42 = vld [vmem:[%s2669_s5 + $0x368] sm:$0xff]  ;;  %v1871_v46 = vadd.f32 %v1870_v36, %v1712_v25  ;;  %v607_v53 = vld [vmem:[%s2676_s13 + $0x370] sm:$0xff]  ;;  %v1562_v40 = vsub.f32 %v1242_v26, %v1402_v27  ;;  %v1721_v51 = vand.u32 2147483647, %v1561_v30 }
 0x15f   : > { %v766_v57 = vsub.f32 %v446_v42, %v606_v43  ;;  %v925_v4 = vmul.f32 %v765_v47, %v765_v47  ;;  %v1243_v36 = vld [vmem:[%s2682_s23 + $0x328] sm:$0xff]  ;;  %v1404_v47 = vld [vmem:[%s2685_s7 + $0x330] sm:$0xff] }
 0x160   : > { %v1076_v9 = vadd.f32 %v1075_v63, %v917_v52  ;;  %v447_v52 = vld [vmem:[%s2669_s5 + $0x370] sm:$0xff]  ;;  %v1872_v56 = vadd.f32 %v1871_v46, %v1713_v35  ;;  %v608_v63 = vld [vmem:[%s2676_s13 + $0x378] sm:$0xff]  ;;  %v1563_v50 = vsub.f32 %v1243_v36, %v1403_v37  ;;  %v1722_v61 = vand.u32 2147483647, %v1562_v40 }
 0x161   : > { %v767_v3 = vsub.f32 %v447_v52, %v607_v53  ;;  %v926_v14 = vmul.f32 %v766_v57, %v766_v57  ;;  %v1244_v46 = vld [vmem:[%s2682_s23 + $0x330] sm:$0xff]  ;;  %v1405_v57 = vld [vmem:[%s2685_s7 + $0x338] sm:$0xff] }
 0x162   : > { %v1077_v19 = vadd.f32 %v1076_v9, %v918_v62  ;;  %v448_v62 = vld [vmem:[%s2669_s5 + $0x378] sm:$0xff]  ;;  %v1873_v2 = vadd.f32 %v1872_v56, %v1714_v45  ;;  %v609_v9 = vld [vmem:[%s2676_s13 + $0x380] sm:$0xff]  ;;  %v1564_v60 = vsub.f32 %v1244_v46, %v1404_v47  ;;  %v1723_v7 = vand.u32 2147483647, %v1563_v50 }
 0x163   : > { %v768_v13 = vsub.f32 %v448_v62, %v608_v63  ;;  %v927_v24 = vmul.f32 %v767_v3, %v767_v3  ;;  %v1245_v56 = vld [vmem:[%s2682_s23 + $0x338] sm:$0xff]  ;;  %v1406_v3 = vld [vmem:[%s2685_s7 + $0x340] sm:$0xff] }
 0x164   : > { %v1078_v29 = vadd.f32 %v1077_v19, %v919_v8  ;;  %v449_v8 = vld [vmem:[%s2669_s5 + $0x380] sm:$0xff]  ;;  %v1874_v12 = vadd.f32 %v1873_v2, %v1715_v55  ;;  %v610_v19 = vld [vmem:[%s2676_s13 + $0x388] sm:$0xff]  ;;  %v1565_v6 = vsub.f32 %v1245_v56, %v1405_v57  ;;  %v1724_v17 = vand.u32 2147483647, %v1564_v60 }
 0x165   : > { %v769_v23 = vsub.f32 %v449_v8, %v609_v9  ;;  %v928_v34 = vmul.f32 %v768_v13, %v768_v13  ;;  %v1246_v2 = vld [vmem:[%s2682_s23 + $0x340] sm:$0xff]  ;;  %v1407_v13 = vld [vmem:[%s2685_s7 + $0x348] sm:$0xff] }
 0x166   : > { %v1079_v39 = vadd.f32 %v1078_v29, %v920_v18  ;;  %v450_v18 = vld [vmem:[%s2669_s5 + $0x388] sm:$0xff]  ;;  %v1875_v22 = vadd.f32 %v1874_v12, %v1716_v1  ;;  %v611_v29 = vld [vmem:[%s2676_s13 + $0x390] sm:$0xff]  ;;  %v1566_v16 = vsub.f32 %v1246_v2, %v1406_v3  ;;  %v1725_v27 = vand.u32 2147483647, %v1565_v6 }
 0x167   : > { %v770_v33 = vsub.f32 %v450_v18, %v610_v19  ;;  %v929_v44 = vmul.f32 %v769_v23, %v769_v23  ;;  %v1247_v12 = vld [vmem:[%s2682_s23 + $0x348] sm:$0xff]  ;;  %v1408_v23 = vld [vmem:[%s2685_s7 + $0x350] sm:$0xff] }
 0x168   : > { %v1080_v49 = vadd.f32 %v1079_v39, %v921_v28  ;;  %v451_v28 = vld [vmem:[%s2669_s5 + $0x390] sm:$0xff]  ;;  %v1876_v32 = vadd.f32 %v1875_v22, %v1717_v11  ;;  %v612_v39 = vld [vmem:[%s2676_s13 + $0x398] sm:$0xff]  ;;  %v1567_v26 = vsub.f32 %v1247_v12, %v1407_v13  ;;  %v1726_v37 = vand.u32 2147483647, %v1566_v16 }
 0x169   : > { %v771_v43 = vsub.f32 %v451_v28, %v611_v29  ;;  %v930_v54 = vmul.f32 %v770_v33, %v770_v33  ;;  %v1248_v22 = vld [vmem:[%s2682_s23 + $0x350] sm:$0xff]  ;;  %v1409_v33 = vld [vmem:[%s2685_s7 + $0x358] sm:$0xff] }
 0x16a   : > { %v1081_v59 = vadd.f32 %v1080_v49, %v922_v38  ;;  %v452_v38 = vld [vmem:[%s2669_s5 + $0x398] sm:$0xff]  ;;  %v1877_v42 = vadd.f32 %v1876_v32, %v1718_v21  ;;  %v613_v49 = vld [vmem:[%s2676_s13 + $0x3a0] sm:$0xff]  ;;  %v1568_v36 = vsub.f32 %v1248_v22, %v1408_v23  ;;  %v1727_v47 = vand.u32 2147483647, %v1567_v26 }
 0x16b   : > { %v772_v53 = vsub.f32 %v452_v38, %v612_v39  ;;  %v931_v0 = vmul.f32 %v771_v43, %v771_v43  ;;  %v1249_v32 = vld [vmem:[%s2682_s23 + $0x358] sm:$0xff]  ;;  %v1410_v43 = vld [vmem:[%s2685_s7 + $0x360] sm:$0xff] }
 0x16c   : > { %v1082_v5 = vadd.f32 %v1081_v59, %v923_v48  ;;  %v453_v48 = vld [vmem:[%s2669_s5 + $0x3a0] sm:$0xff]  ;;  %v1878_v52 = vadd.f32 %v1877_v42, %v1719_v31  ;;  %v614_v59 = vld [vmem:[%s2676_s13 + $0x3a8] sm:$0xff]  ;;  %v1569_v46 = vsub.f32 %v1249_v32, %v1409_v33  ;;  %v1728_v57 = vand.u32 2147483647, %v1568_v36 }
 0x16d   : > { %v773_v63 = vsub.f32 %v453_v48, %v613_v49  ;;  %v932_v10 = vmul.f32 %v772_v53, %v772_v53  ;;  %v1250_v42 = vld [vmem:[%s2682_s23 + $0x360] sm:$0xff]  ;;  %v1411_v53 = vld [vmem:[%s2685_s7 + $0x368] sm:$0xff] }
 0x16e   : > { %v1083_v15 = vadd.f32 %v1082_v5, %v924_v58  ;;  %v454_v58 = vld [vmem:[%s2669_s5 + $0x3a8] sm:$0xff]  ;;  %v1879_v62 = vadd.f32 %v1878_v52, %v1720_v41  ;;  %v615_v5 = vld [vmem:[%s2676_s13 + $0x3b0] sm:$0xff]  ;;  %v1570_v56 = vsub.f32 %v1250_v42, %v1410_v43  ;;  %v1729_v3 = vand.u32 2147483647, %v1569_v46 }
 0x16f   : > { %v774_v9 = vsub.f32 %v454_v58, %v614_v59  ;;  %v933_v20 = vmul.f32 %v773_v63, %v773_v63  ;;  %v1251_v52 = vld [vmem:[%s2682_s23 + $0x368] sm:$0xff]  ;;  %v1412_v63 = vld [vmem:[%s2685_s7 + $0x370] sm:$0xff] }
 0x170   : > { %v1084_v25 = vadd.f32 %v1083_v15, %v925_v4  ;;  %v455_v4 = vld [vmem:[%s2669_s5 + $0x3b0] sm:$0xff]  ;;  %v1880_v8 = vadd.f32 %v1879_v62, %v1721_v51  ;;  %v616_v15 = vld [vmem:[%s2676_s13 + $0x3b8] sm:$0xff]  ;;  %v1571_v2 = vsub.f32 %v1251_v52, %v1411_v53  ;;  %v1730_v13 = vand.u32 2147483647, %v1570_v56 }
 0x171   : > { %v775_v19 = vsub.f32 %v455_v4, %v615_v5  ;;  %v934_v30 = vmul.f32 %v774_v9, %v774_v9  ;;  %v1252_v62 = vld [vmem:[%s2682_s23 + $0x370] sm:$0xff]  ;;  %v1413_v9 = vld [vmem:[%s2685_s7 + $0x378] sm:$0xff] }
 0x172   : > { %v1085_v35 = vadd.f32 %v1084_v25, %v926_v14  ;;  %v456_v14 = vld [vmem:[%s2669_s5 + $0x3b8] sm:$0xff]  ;;  %v1881_v18 = vadd.f32 %v1880_v8, %v1722_v61  ;;  %v617_v25 = vld [vmem:[%s2676_s13 + $0x3c0] sm:$0xff]  ;;  %v1572_v12 = vsub.f32 %v1252_v62, %v1412_v63  ;;  %v1731_v23 = vand.u32 2147483647, %v1571_v2 }
 0x173   : > { %v776_v29 = vsub.f32 %v456_v14, %v616_v15  ;;  %v935_v40 = vmul.f32 %v775_v19, %v775_v19  ;;  %v1253_v8 = vld [vmem:[%s2682_s23 + $0x378] sm:$0xff]  ;;  %v1414_v19 = vld [vmem:[%s2685_s7 + $0x380] sm:$0xff] }
 0x174   : > { %v1086_v45 = vadd.f32 %v1085_v35, %v927_v24  ;;  %v457_v24 = vld [vmem:[%s2669_s5 + $0x3c0] sm:$0xff]  ;;  %v1882_v28 = vadd.f32 %v1881_v18, %v1723_v7  ;;  %v618_v35 = vld [vmem:[%s2676_s13 + $0x3c8] sm:$0xff]  ;;  %v1573_v22 = vsub.f32 %v1253_v8, %v1413_v9  ;;  %v1732_v33 = vand.u32 2147483647, %v1572_v12 }
 0x175   : > { %v777_v39 = vsub.f32 %v457_v24, %v617_v25  ;;  %v936_v50 = vmul.f32 %v776_v29, %v776_v29  ;;  %v1254_v18 = vld [vmem:[%s2682_s23 + $0x380] sm:$0xff]  ;;  %v1415_v29 = vld [vmem:[%s2685_s7 + $0x388] sm:$0xff] }
 0x176   : > { %v1087_v55 = vadd.f32 %v1086_v45, %v928_v34  ;;  %v458_v34 = vld [vmem:[%s2669_s5 + $0x3c8] sm:$0xff]  ;;  %v1883_v38 = vadd.f32 %v1882_v28, %v1724_v17  ;;  %v619_v45 = vld [vmem:[%s2676_s13 + $0x3d0] sm:$0xff]  ;;  %v1574_v32 = vsub.f32 %v1254_v18, %v1414_v19  ;;  %v1733_v43 = vand.u32 2147483647, %v1573_v22 }
 0x177   : > { %v778_v49 = vsub.f32 %v458_v34, %v618_v35  ;;  %v937_v60 = vmul.f32 %v777_v39, %v777_v39  ;;  %v1255_v28 = vld [vmem:[%s2682_s23 + $0x388] sm:$0xff]  ;;  %v1416_v39 = vld [vmem:[%s2685_s7 + $0x390] sm:$0xff] }
 0x178   : > { %v1088_v1 = vadd.f32 %v1087_v55, %v929_v44  ;;  %v459_v44 = vld [vmem:[%s2669_s5 + $0x3d0] sm:$0xff]  ;;  %v1884_v48 = vadd.f32 %v1883_v38, %v1725_v27  ;;  %v620_v55 = vld [vmem:[%s2676_s13 + $0x3d8] sm:$0xff]  ;;  %v1575_v42 = vsub.f32 %v1255_v28, %v1415_v29  ;;  %v1734_v53 = vand.u32 2147483647, %v1574_v32 }
 0x179   : > { %v779_v59 = vsub.f32 %v459_v44, %v619_v45  ;;  %v938_v6 = vmul.f32 %v778_v49, %v778_v49  ;;  %v1256_v38 = vld [vmem:[%s2682_s23 + $0x390] sm:$0xff]  ;;  %v1417_v49 = vld [vmem:[%s2685_s7 + $0x398] sm:$0xff] }
 0x17a   : > { %v1089_v11 = vadd.f32 %v1088_v1, %v930_v54  ;;  %v460_v54 = vld [vmem:[%s2669_s5 + $0x3d8] sm:$0xff]  ;;  %v1885_v58 = vadd.f32 %v1884_v48, %v1726_v37  ;;  %v621_v1 = vld [vmem:[%s2676_s13 + $0x3e0] sm:$0xff]  ;;  %v1576_v52 = vsub.f32 %v1256_v38, %v1416_v39  ;;  %v1735_v63 = vand.u32 2147483647, %v1575_v42 }
 0x17b   : > { %v780_v5 = vsub.f32 %v460_v54, %v620_v55  ;;  %v939_v16 = vmul.f32 %v779_v59, %v779_v59  ;;  %v1257_v48 = vld [vmem:[%s2682_s23 + $0x398] sm:$0xff]  ;;  %v1418_v59 = vld [vmem:[%s2685_s7 + $0x3a0] sm:$0xff] }
 0x17c   : > { %v1090_v21 = vadd.f32 %v1089_v11, %v931_v0  ;;  %v461_v0 = vld [vmem:[%s2669_s5 + $0x3e0] sm:$0xff]  ;;  %v1886_v4 = vadd.f32 %v1885_v58, %v1727_v47  ;;  %v622_v11 = vld [vmem:[%s2676_s13 + $0x3e8] sm:$0xff]  ;;  %v1577_v62 = vsub.f32 %v1257_v48, %v1417_v49  ;;  %v1736_v9 = vand.u32 2147483647, %v1576_v52 }
 0x17d   : > { %v781_v15 = vsub.f32 %v461_v0, %v621_v1  ;;  %v940_v26 = vmul.f32 %v780_v5, %v780_v5  ;;  %v1258_v58 = vld [vmem:[%s2682_s23 + $0x3a0] sm:$0xff]  ;;  %v1419_v5 = vld [vmem:[%s2685_s7 + $0x3a8] sm:$0xff] }
 0x17e   : > { %v1091_v31 = vadd.f32 %v1090_v21, %v932_v10  ;;  %v462_v10 = vld [vmem:[%s2669_s5 + $0x3e8] sm:$0xff]  ;;  %v1887_v14 = vadd.f32 %v1886_v4, %v1728_v57  ;;  %v623_v21 = vld [vmem:[%s2676_s13 + $0x3f0] sm:$0xff]  ;;  %v1578_v8 = vsub.f32 %v1258_v58, %v1418_v59  ;;  %v1737_v19 = vand.u32 2147483647, %v1577_v62 }
 0x17f   : > { %v782_v25 = vsub.f32 %v462_v10, %v622_v11  ;;  %v941_v36 = vmul.f32 %v781_v15, %v781_v15  ;;  %v1259_v4 = vld [vmem:[%s2682_s23 + $0x3a8] sm:$0xff]  ;;  %v1420_v15 = vld [vmem:[%s2685_s7 + $0x3b0] sm:$0xff] }
 0x180   : > { %v1092_v41 = vadd.f32 %v1091_v31, %v933_v20  ;;  %v463_v20 = vld [vmem:[%s2669_s5 + $0x3f0] sm:$0xff]  ;;  %v1888_v24 = vadd.f32 %v1887_v14, %v1729_v3  ;;  %v624_v31 = vld [vmem:[%s2676_s13 + $0x3f8] sm:$0xff]  ;;  %v1579_v18 = vsub.f32 %v1259_v4, %v1419_v5  ;;  %v1738_v29 = vand.u32 2147483647, %v1578_v8 }
 0x181   : > { %v783_v35 = vsub.f32 %v463_v20, %v623_v21  ;;  %v942_v46 = vmul.f32 %v782_v25, %v782_v25  ;;  %v1260_v14 = vld [vmem:[%s2682_s23 + $0x3b0] sm:$0xff]  ;;  %v1421_v25 = vld [vmem:[%s2685_s7 + $0x3b8] sm:$0xff] }
 0x182   : > { %v1093_v51 = vadd.f32 %v1092_v41, %v934_v30  ;;  %v464_v30 = vld [vmem:[%s2669_s5 + $0x3f8] sm:$0xff]  ;;  %v1889_v34 = vadd.f32 %v1888_v24, %v1730_v13  ;;  %v625_v41 = vld [vmem:[%s2676_s13 + $0x400] sm:$0xff]  ;;  %v1580_v28 = vsub.f32 %v1260_v14, %v1420_v15  ;;  %v1739_v39 = vand.u32 2147483647, %v1579_v18 }
 0x183   : > { %v784_v45 = vsub.f32 %v464_v30, %v624_v31  ;;  %v943_v56 = vmul.f32 %v783_v35, %v783_v35  ;;  %v1261_v24 = vld [vmem:[%s2682_s23 + $0x3b8] sm:$0xff]  ;;  %v1422_v35 = vld [vmem:[%s2685_s7 + $0x3c0] sm:$0xff] }
 0x184   : > { %v1094_v61 = vadd.f32 %v1093_v51, %v935_v40  ;;  %v465_v40 = vld [vmem:[%s2669_s5 + $0x400] sm:$0xff]  ;;  %v1890_v44 = vadd.f32 %v1889_v34, %v1731_v23  ;;  %v626_v51 = vld [vmem:[%s2676_s13 + $0x408] sm:$0xff]  ;;  %v1581_v38 = vsub.f32 %v1261_v24, %v1421_v25  ;;  %v1740_v49 = vand.u32 2147483647, %v1580_v28 }
 0x185   : > { %v785_v55 = vsub.f32 %v465_v40, %v625_v41  ;;  %v944_v2 = vmul.f32 %v784_v45, %v784_v45  ;;  %v1262_v34 = vld [vmem:[%s2682_s23 + $0x3c0] sm:$0xff]  ;;  %v1423_v45 = vld [vmem:[%s2685_s7 + $0x3c8] sm:$0xff] }
 0x186   : > { %v1095_v7 = vadd.f32 %v1094_v61, %v936_v50  ;;  %v466_v50 = vld [vmem:[%s2669_s5 + $0x408] sm:$0xff]  ;;  %v1891_v54 = vadd.f32 %v1890_v44, %v1732_v33  ;;  %v627_v61 = vld [vmem:[%s2676_s13 + $0x410] sm:$0xff]  ;;  %v1582_v48 = vsub.f32 %v1262_v34, %v1422_v35  ;;  %v1741_v59 = vand.u32 2147483647, %v1581_v38 }
 0x187   : > { %v786_v1 = vsub.f32 %v466_v50, %v626_v51  ;;  %v945_v12 = vmul.f32 %v785_v55, %v785_v55  ;;  %v1263_v44 = vld [vmem:[%s2682_s23 + $0x3c8] sm:$0xff]  ;;  %v1424_v55 = vld [vmem:[%s2685_s7 + $0x3d0] sm:$0xff] }
 0x188   : > { %v1096_v17 = vadd.f32 %v1095_v7, %v937_v60  ;;  %v467_v60 = vld [vmem:[%s2669_s5 + $0x410] sm:$0xff]  ;;  %v1892_v0 = vadd.f32 %v1891_v54, %v1733_v43  ;;  %v628_v7 = vld [vmem:[%s2676_s13 + $0x418] sm:$0xff]  ;;  %v1583_v58 = vsub.f32 %v1263_v44, %v1423_v45  ;;  %v1742_v5 = vand.u32 2147483647, %v1582_v48 }
 0x189   : > { %v787_v11 = vsub.f32 %v467_v60, %v627_v61  ;;  %v946_v22 = vmul.f32 %v786_v1, %v786_v1  ;;  %v1264_v54 = vld [vmem:[%s2682_s23 + $0x3d0] sm:$0xff]  ;;  %v1425_v1 = vld [vmem:[%s2685_s7 + $0x3d8] sm:$0xff] }
 0x18a   : > { %v1097_v27 = vadd.f32 %v1096_v17, %v938_v6  ;;  %v468_v6 = vld [vmem:[%s2669_s5 + $0x418] sm:$0xff]  ;;  %v1893_v10 = vadd.f32 %v1892_v0, %v1734_v53  ;;  %v629_v17 = vld [vmem:[%s2676_s13 + $0x420] sm:$0xff]  ;;  %v1584_v4 = vsub.f32 %v1264_v54, %v1424_v55  ;;  %v1743_v15 = vand.u32 2147483647, %v1583_v58 }
 0x18b   : > { %v788_v21 = vsub.f32 %v468_v6, %v628_v7  ;;  %v947_v32 = vmul.f32 %v787_v11, %v787_v11  ;;  %v1265_v0 = vld [vmem:[%s2682_s23 + $0x3d8] sm:$0xff]  ;;  %v1426_v11 = vld [vmem:[%s2685_s7 + $0x3e0] sm:$0xff] }
 0x18c   : > { %v1098_v37 = vadd.f32 %v1097_v27, %v939_v16  ;;  %v469_v16 = vld [vmem:[%s2669_s5 + $0x420] sm:$0xff]  ;;  %v1894_v20 = vadd.f32 %v1893_v10, %v1735_v63  ;;  %v630_v27 = vld [vmem:[%s2676_s13 + $0x428] sm:$0xff]  ;;  %v1585_v14 = vsub.f32 %v1265_v0, %v1425_v1  ;;  %v1744_v25 = vand.u32 2147483647, %v1584_v4 }
 0x18d   : > { %v789_v31 = vsub.f32 %v469_v16, %v629_v17  ;;  %v948_v42 = vmul.f32 %v788_v21, %v788_v21  ;;  %v1266_v10 = vld [vmem:[%s2682_s23 + $0x3e0] sm:$0xff]  ;;  %v1427_v21 = vld [vmem:[%s2685_s7 + $0x3e8] sm:$0xff] }
 0x18e   : > { %v1099_v47 = vadd.f32 %v1098_v37, %v940_v26  ;;  %v470_v26 = vld [vmem:[%s2669_s5 + $0x428] sm:$0xff]  ;;  %v1895_v30 = vadd.f32 %v1894_v20, %v1736_v9  ;;  %v631_v37 = vld [vmem:[%s2676_s13 + $0x430] sm:$0xff]  ;;  %v1586_v24 = vsub.f32 %v1266_v10, %v1426_v11  ;;  %v1745_v35 = vand.u32 2147483647, %v1585_v14 }
 0x18f   : > { %v790_v41 = vsub.f32 %v470_v26, %v630_v27  ;;  %v949_v52 = vmul.f32 %v789_v31, %v789_v31  ;;  %v1267_v20 = vld [vmem:[%s2682_s23 + $0x3e8] sm:$0xff]  ;;  %v1428_v31 = vld [vmem:[%s2685_s7 + $0x3f0] sm:$0xff] }
 0x190   : > { %v1100_v57 = vadd.f32 %v1099_v47, %v941_v36  ;;  %v471_v36 = vld [vmem:[%s2669_s5 + $0x430] sm:$0xff]  ;;  %v1896_v40 = vadd.f32 %v1895_v30, %v1737_v19  ;;  %v632_v47 = vld [vmem:[%s2676_s13 + $0x438] sm:$0xff]  ;;  %v1587_v34 = vsub.f32 %v1267_v20, %v1427_v21  ;;  %v1746_v45 = vand.u32 2147483647, %v1586_v24 }
 0x191   : > { %v791_v51 = vsub.f32 %v471_v36, %v631_v37  ;;  %v950_v62 = vmul.f32 %v790_v41, %v790_v41  ;;  %v1268_v30 = vld [vmem:[%s2682_s23 + $0x3f0] sm:$0xff]  ;;  %v1429_v41 = vld [vmem:[%s2685_s7 + $0x3f8] sm:$0xff] }
 0x192   : > { %v1101_v3 = vadd.f32 %v1100_v57, %v942_v46  ;;  %v472_v46 = vld [vmem:[%s2669_s5 + $0x438] sm:$0xff]  ;;  %v1897_v50 = vadd.f32 %v1896_v40, %v1738_v29  ;;  %v633_v57 = vld [vmem:[%s2676_s13 + $0x440] sm:$0xff]  ;;  %v1588_v44 = vsub.f32 %v1268_v30, %v1428_v31  ;;  %v1747_v55 = vand.u32 2147483647, %v1587_v34 }
 0x193   : > { %v792_v61 = vsub.f32 %v472_v46, %v632_v47  ;;  %v951_v8 = vmul.f32 %v791_v51, %v791_v51  ;;  %v1269_v40 = vld [vmem:[%s2682_s23 + $0x3f8] sm:$0xff]  ;;  %v1430_v51 = vld [vmem:[%s2685_s7 + $0x400] sm:$0xff] }
 0x194   : > { %v1102_v13 = vadd.f32 %v1101_v3, %v943_v56  ;;  %v473_v56 = vld [vmem:[%s2669_s5 + $0x440] sm:$0xff]  ;;  %v1898_v60 = vadd.f32 %v1897_v50, %v1739_v39  ;;  %v634_v3 = vld [vmem:[%s2676_s13 + $0x448] sm:$0xff]  ;;  %v1589_v54 = vsub.f32 %v1269_v40, %v1429_v41  ;;  %v1748_v1 = vand.u32 2147483647, %v1588_v44 }
 0x195   : > { %v793_v7 = vsub.f32 %v473_v56, %v633_v57  ;;  %v952_v18 = vmul.f32 %v792_v61, %v792_v61  ;;  %v1270_v50 = vld [vmem:[%s2682_s23 + $0x400] sm:$0xff]  ;;  %v1431_v61 = vld [vmem:[%s2685_s7 + $0x408] sm:$0xff] }
 0x196   : > { %v1103_v23 = vadd.f32 %v1102_v13, %v944_v2  ;;  %v474_v2 = vld [vmem:[%s2669_s5 + $0x448] sm:$0xff]  ;;  %v1899_v6 = vadd.f32 %v1898_v60, %v1740_v49  ;;  %v635_v13 = vld [vmem:[%s2676_s13 + $0x450] sm:$0xff]  ;;  %v1590_v0 = vsub.f32 %v1270_v50, %v1430_v51  ;;  %v1749_v11 = vand.u32 2147483647, %v1589_v54 }
 0x197   : > { %v794_v17 = vsub.f32 %v474_v2, %v634_v3  ;;  %v953_v28 = vmul.f32 %v793_v7, %v793_v7  ;;  %v1271_v60 = vld [vmem:[%s2682_s23 + $0x408] sm:$0xff]  ;;  %v1432_v7 = vld [vmem:[%s2685_s7 + $0x410] sm:$0xff] }
 0x198   : > { %v1104_v33 = vadd.f32 %v1103_v23, %v945_v12  ;;  %v475_v12 = vld [vmem:[%s2669_s5 + $0x450] sm:$0xff]  ;;  %v1900_v16 = vadd.f32 %v1899_v6, %v1741_v59  ;;  %v636_v23 = vld [vmem:[%s2676_s13 + $0x458] sm:$0xff]  ;;  %v1591_v10 = vsub.f32 %v1271_v60, %v1431_v61  ;;  %v1750_v21 = vand.u32 2147483647, %v1590_v0 }
 0x199   : > { %v795_v27 = vsub.f32 %v475_v12, %v635_v13  ;;  %v954_v38 = vmul.f32 %v794_v17, %v794_v17  ;;  %v1272_v6 = vld [vmem:[%s2682_s23 + $0x410] sm:$0xff]  ;;  %v1433_v17 = vld [vmem:[%s2685_s7 + $0x418] sm:$0xff] }
 0x19a   : > { %v1105_v43 = vadd.f32 %v1104_v33, %v946_v22  ;;  %v476_v22 = vld [vmem:[%s2669_s5 + $0x458] sm:$0xff]  ;;  %v1901_v26 = vadd.f32 %v1900_v16, %v1742_v5  ;;  %v637_v33 = vld [vmem:[%s2676_s13 + $0x460] sm:$0xff]  ;;  %v1592_v20 = vsub.f32 %v1272_v6, %v1432_v7  ;;  %v1751_v31 = vand.u32 2147483647, %v1591_v10 }
 0x19b   : > { %v796_v37 = vsub.f32 %v476_v22, %v636_v23  ;;  %v955_v48 = vmul.f32 %v795_v27, %v795_v27  ;;  %v1273_v16 = vld [vmem:[%s2682_s23 + $0x418] sm:$0xff]  ;;  %v1434_v27 = vld [vmem:[%s2685_s7 + $0x420] sm:$0xff] }
 0x19c   : > { %v1106_v53 = vadd.f32 %v1105_v43, %v947_v32  ;;  %v477_v32 = vld [vmem:[%s2669_s5 + $0x460] sm:$0xff]  ;;  %v1902_v36 = vadd.f32 %v1901_v26, %v1743_v15  ;;  %v638_v43 = vld [vmem:[%s2676_s13 + $0x468] sm:$0xff]  ;;  %v1593_v30 = vsub.f32 %v1273_v16, %v1433_v17  ;;  %v1752_v41 = vand.u32 2147483647, %v1592_v20 }
 0x19d   : > { %v797_v47 = vsub.f32 %v477_v32, %v637_v33  ;;  %v956_v58 = vmul.f32 %v796_v37, %v796_v37  ;;  %v1274_v26 = vld [vmem:[%s2682_s23 + $0x420] sm:$0xff]  ;;  %v1435_v37 = vld [vmem:[%s2685_s7 + $0x428] sm:$0xff] }
 0x19e   : > { %v1107_v63 = vadd.f32 %v1106_v53, %v948_v42  ;;  %v478_v42 = vld [vmem:[%s2669_s5 + $0x468] sm:$0xff]  ;;  %v1903_v46 = vadd.f32 %v1902_v36, %v1744_v25  ;;  %v639_v53 = vld [vmem:[%s2676_s13 + $0x470] sm:$0xff]  ;;  %v1594_v40 = vsub.f32 %v1274_v26, %v1434_v27  ;;  %v1753_v51 = vand.u32 2147483647, %v1593_v30 }
 0x19f   : > { %v798_v57 = vsub.f32 %v478_v42, %v638_v43  ;;  %v957_v4 = vmul.f32 %v797_v47, %v797_v47  ;;  %v1275_v36 = vld [vmem:[%s2682_s23 + $0x428] sm:$0xff]  ;;  %v1436_v47 = vld [vmem:[%s2685_s7 + $0x430] sm:$0xff] }
 0x1a0   : > { %v1108_v9 = vadd.f32 %v1107_v63, %v949_v52  ;;  %v479_v52 = vld [vmem:[%s2669_s5 + $0x470] sm:$0xff]  ;;  %v1904_v56 = vadd.f32 %v1903_v46, %v1745_v35  ;;  %v640_v63 = vld [vmem:[%s2676_s13 + $0x478] sm:$0xff]  ;;  %v1595_v50 = vsub.f32 %v1275_v36, %v1435_v37  ;;  %v1754_v61 = vand.u32 2147483647, %v1594_v40 }
 0x1a1   : > { %v799_v3 = vsub.f32 %v479_v52, %v639_v53  ;;  %v958_v14 = vmul.f32 %v798_v57, %v798_v57  ;;  %v1276_v46 = vld [vmem:[%s2682_s23 + $0x430] sm:$0xff]  ;;  %v1437_v57 = vld [vmem:[%s2685_s7 + $0x438] sm:$0xff] }
 0x1a2   : > { %v1109_v19 = vadd.f32 %v1108_v9, %v950_v62  ;;  %v480_v62 = vld [vmem:[%s2669_s5 + $0x478] sm:$0xff]  ;;  %v1905_v2 = vadd.f32 %v1904_v56, %v1746_v45  ;;  %v641_v9 = vld [vmem:[%s2676_s13 + $0x480] sm:$0xff]  ;;  %v1596_v60 = vsub.f32 %v1276_v46, %v1436_v47  ;;  %v1755_v7 = vand.u32 2147483647, %v1595_v50  ;;  %v1443_v50 = vld [vmem:[%s2685_s7 + $0x468] sm:$0xff] }
 0x1a3   : > { %v800_v13 = vsub.f32 %v480_v62, %v640_v63  ;;  %v959_v24 = vmul.f32 %v799_v3, %v799_v3  ;;  %v1277_v56 = vld [vmem:[%s2682_s23 + $0x438] sm:$0xff]  ;;  %v1438_v3 = vld [vmem:[%s2685_s7 + $0x440] sm:$0xff] }
 0x1a4   : > { %v1110_v29 = vadd.f32 %v1109_v19, %v951_v8  ;;  %v481_v8 = vld [vmem:[%s2669_s5 + $0x480] sm:$0xff]  ;;  %v1906_v12 = vadd.f32 %v1905_v2, %v1747_v55  ;;  %v642_v19 = vld [vmem:[%s2676_s13 + $0x488] sm:$0xff]  ;;  %v1597_v6 = vsub.f32 %v1277_v56, %v1437_v57  ;;  %v1756_v17 = vand.u32 2147483647, %v1596_v60  ;;  %v1444_v60 = vld [vmem:[%s2685_s7 + $0x470] sm:$0xff] }
 0x1a5   : > { %v801_v23 = vsub.f32 %v481_v8, %v641_v9  ;;  %v960_v34 = vmul.f32 %v800_v13, %v800_v13  ;;  %v1278_v2 = vld [vmem:[%s2682_s23 + $0x440] sm:$0xff]  ;;  %v1439_v13 = vld [vmem:[%s2685_s7 + $0x448] sm:$0xff] }
 0x1a6   : > { %v1111_v39 = vadd.f32 %v1110_v29, %v952_v18  ;;  %v482_v18 = vld [vmem:[%s2669_s5 + $0x488] sm:$0xff]  ;;  %v1907_v22 = vadd.f32 %v1906_v12, %v1748_v1  ;;  %v643_v29 = vld [vmem:[%s2676_s13 + $0x490] sm:$0xff]  ;;  %v1598_v16 = vsub.f32 %v1278_v2, %v1438_v3  ;;  %v1757_v27 = vand.u32 2147483647, %v1597_v6  ;;  %v1285_v2 = vld [vmem:[%s2682_s23 + $0x478] sm:$0xff] }
 0x1a7   : > { %v802_v33 = vsub.f32 %v482_v18, %v642_v19  ;;  %v961_v44 = vmul.f32 %v801_v23, %v801_v23  ;;  %v1279_v12 = vld [vmem:[%s2682_s23 + $0x448] sm:$0xff]  ;;  %v1440_v23 = vld [vmem:[%s2685_s7 + $0x450] sm:$0xff]  ;;  %v1445_v3 = vld [vmem:[%s2685_s7 + $0x478] sm:$0xff] }
 0x1a8   : > { %v1112_v49 = vadd.f32 %v1111_v39, %v953_v28  ;;  %v483_v28 = vld [vmem:[%s2669_s5 + $0x490] sm:$0xff]  ;;  %v1908_v32 = vadd.f32 %v1907_v22, %v1749_v11  ;;  %v644_v39 = vld [vmem:[%s2676_s13 + $0x498] sm:$0xff]  ;;  %v1599_v26 = vsub.f32 %v1279_v12, %v1439_v13  ;;  %v1758_v36 = vand.u32 2147483647, %v1598_v16  ;;  %v1446_v12 = vld [vmem:[%s2685_s7 + $0x480] sm:$0xff] }
 0x1a9   : > { %v803_v43 = vsub.f32 %v483_v28, %v643_v29  ;;  %v962_v54 = vmul.f32 %v802_v33, %v802_v33  ;;  %v1280_v22 = vld [vmem:[%s2682_s23 + $0x450] sm:$0xff]  ;;  %v1441_v33 = vld [vmem:[%s2685_s7 + $0x458] sm:$0xff]  ;;  %v1605_v13 = vsub.f32 %v1285_v2, %v1445_v3 }
 0x1aa   : > { %v1113_v59 = vadd.f32 %v1112_v49, %v954_v38  ;;  %v484_v38 = vld [vmem:[%s2669_s5 + $0x498] sm:$0xff]  ;;  %v1909_v42 = vadd.f32 %v1908_v32, %v1750_v21  ;;  %v645_v49 = vld [vmem:[%s2676_s13 + $0x4a0] sm:$0xff] }
 0x1ab   : > { %v804_v53 = vsub.f32 %v484_v38, %v644_v39  ;;  %v963_v0 = vmul.f32 %v803_v43, %v803_v43  ;;  %v1281_v32 = vld [vmem:[%s2682_s23 + $0x458] sm:$0xff]  ;;  %v650_v38 = vld [vmem:[%s2676_s13 + $0x4c8] sm:$0xff]  ;;  %v1442_v43 = vld [vmem:[%s2685_s7 + $0x460] sm:$0xff] }
 0x1ac   : > { %v1114_v5 = vadd.f32 %v1113_v59, %v955_v48  ;;  %v485_v48 = vld [vmem:[%s2669_s5 + $0x4a0] sm:$0xff]  ;;  %v1910_v52 = vadd.f32 %v1909_v42, %v1751_v31  ;;  %v646_v59 = vld [vmem:[%s2676_s13 + $0x4a8] sm:$0xff]  ;;  %v656_v2 = vld [vmem:[%s2676_s13 + $0x4f8] sm:$0xff] }
 0x1ad   : > { %v805_v63 = vsub.f32 %v485_v48, %v645_v49  ;;  %v964_v10 = vmul.f32 %v804_v53, %v804_v53  ;;  %v1282_v42 = vld [vmem:[%s2682_s23 + $0x460] sm:$0xff]  ;;  %v1283_v49 = vld [vmem:[%s2682_s23 + $0x468] sm:$0xff] }
 0x1ae   : > { %v1115_v15 = vadd.f32 %v1114_v5, %v956_v58  ;;  %v486_v58 = vld [vmem:[%s2669_s5 + $0x4a8] sm:$0xff]  ;;  %v1911_v62 = vadd.f32 %v1910_v52, %v1752_v41  ;;  %v647_v5 = vld [vmem:[%s2676_s13 + $0x4b0] sm:$0xff] }
 0x1af   : > { %v806_v9 = vsub.f32 %v486_v58, %v646_v59  ;;  %v965_v20 = vmul.f32 %v805_v63, %v805_v63  ;;  %v651_v52 = vld [vmem:[%s2676_s13 + $0x4d0] sm:$0xff] }
 0x1b0   : > { %v1116_v25 = vadd.f32 %v1115_v15, %v957_v4  ;;  %v487_v4 = vld [vmem:[%s2669_s5 + $0x4b0] sm:$0xff]  ;;  %v1912_v8 = vadd.f32 %v1911_v62, %v1753_v51  ;;  %v648_v15 = vld [vmem:[%s2676_s13 + $0x4b8] sm:$0xff] }
 0x1b1   : > { %v807_v19 = vsub.f32 %v487_v4, %v647_v5  ;;  %v966_v30 = vmul.f32 %v806_v9, %v806_v9  ;;  %v491_v51 = vld [vmem:[%s2669_s5 + $0x4d0] sm:$0xff]  ;;  %v492_v4 = vld [vmem:[%s2669_s5 + $0x4d8] sm:$0xff] }
 0x1b2   : > { %v1117_v35 = vadd.f32 %v1116_v25, %v958_v14  ;;  %v488_v14 = vld [vmem:[%s2669_s5 + $0x4b8] sm:$0xff]  ;;  %v1913_v18 = vadd.f32 %v1912_v8, %v1754_v61  ;;  %v649_v25 = vld [vmem:[%s2676_s13 + $0x4c0] sm:$0xff]  ;;  %v1284_v59 = vld [vmem:[%s2682_s23 + $0x470] sm:$0xff]  ;;  %v1603_v61 = vsub.f32 %v1283_v49, %v1443_v50 }
 0x1b3   : > { %v808_v29 = vsub.f32 %v488_v14, %v648_v15  ;;  %v967_v40 = vmul.f32 %v807_v19, %v807_v19  ;;  %v652_v5 = vld [vmem:[%s2676_s13 + $0x4d8] sm:$0xff]  ;;  %v1447_v19 = vld [vmem:[%s2685_s7 + $0x488] sm:$0xff]  ;;  %v495_v50 = vld [vmem:[%s2669_s5 + $0x4f0] sm:$0xff] }
 0x1b4   : > { %v1118_v45 = vadd.f32 %v1117_v35, %v959_v24  ;;  %v489_v24 = vld [vmem:[%s2669_s5 + $0x4c0] sm:$0xff]  ;;  %v1914_v28 = vadd.f32 %v1913_v18, %v1755_v7  ;;  %v1600_v35 = vsub.f32 %v1280_v22, %v1440_v23  ;;  %v1604_v7 = vsub.f32 %v1284_v59, %v1444_v60  ;;  %v1287_v18 = vld [vmem:[%s2682_s23 + $0x488] sm:$0xff] }
 0x1b5   : > { %v809_v39 = vsub.f32 %v489_v24, %v649_v25  ;;  %v968_v47 = vmul.f32 %v808_v29, %v808_v29  ;;  %v1763_v14 = vand.u32 2147483647, %v1603_v61  ;;  %v812_v16 = vsub.f32 %v492_v4, %v652_v5  ;;  %v1451_v49 = vld [vmem:[%s2685_s7 + $0x4a8] sm:$0xff] }
 0x1b6   : > { %v1119_v55 = vadd.f32 %v1118_v45, %v960_v34  ;;  %v490_v34 = vld [vmem:[%s2669_s5 + $0x4c8] sm:$0xff]  ;;  %v1915_v37 = vadd.f32 %v1914_v28, %v1756_v17  ;;  %v1759_v45 = vand.u32 2147483647, %v1599_v26  ;;  %v1764_v24 = vand.u32 2147483647, %v1604_v7  ;;  %v1288_v26 = vld [vmem:[%s2682_s23 + $0x490] sm:$0xff] }
 0x1b7   : > { %v810_v53 = vsub.f32 %v490_v34, %v650_v38  ;;  %v969_v57 = vmul.f32 %v809_v39, %v809_v39  ;;  %v1607_v28 = vsub.f32 %v1287_v18, %v1447_v19  ;;  %v1765_v29 = vand.u32 2147483647, %v1605_v13  ;;  %v1449_v34 = vld [vmem:[%s2685_s7 + $0x498] sm:$0xff]  ;;  %v1294_v7 = vld [vmem:[%s2682_s23 + $0x4c0] sm:$0xff] }
 0x1b8   : > { %v1120_v1 = vadd.f32 %v1119_v55, %v961_v44  ;;  %v1601_v44 = vsub.f32 %v1281_v32, %v1441_v33  ;;  %v1916_v46 = vadd.f32 %v1915_v37, %v1757_v27  ;;  %v1760_v55 = vand.u32 2147483647, %v1600_v35  ;;  %v1448_v27 = vld [vmem:[%s2685_s7 + $0x490] sm:$0xff]  ;;  %v1289_v33 = vld [vmem:[%s2682_s23 + $0x498] sm:$0xff]  ;;  %v494_v35 = vld [vmem:[%s2669_s5 + $0x4e8] sm:$0xff] }
 0x1b9   : > { %v970_v6 = vmul.f32 %v810_v53, %v810_v53  ;;  %v972_v32 = vmul.f32 %v812_v16, %v812_v16  ;;  %v1608_v38 = vsub.f32 %v1288_v26, %v1448_v27  ;;  %v1297_v26 = vld [vmem:[%s2682_s23 + $0x4d8] sm:$0xff] }
 0x1ba   : > { %v1121_v11 = vadd.f32 %v1120_v1, %v962_v54  ;;  %v1602_v54 = vsub.f32 %v1282_v42, %v1442_v43  ;;  %v1917_v56 = vadd.f32 %v1916_v46, %v1758_v36  ;;  %v1761_v62 = vand.u32 2147483647, %v1601_v44  ;;  %v654_v36 = vld [vmem:[%s2676_s13 + $0x4e8] sm:$0xff]  ;;  %v1450_v42 = vld [vmem:[%s2685_s7 + $0x4a0] sm:$0xff]  ;;  %v1457_v27 = vld [vmem:[%s2685_s7 + $0x4d8] sm:$0xff] }
 0x1bb   : > { %v1609_v43 = vsub.f32 %v1289_v33, %v1449_v34  ;;  %v1767_v44 = vand.u32 2147483647, %v1607_v28  ;;  %v814_v46 = vsub.f32 %v494_v35, %v654_v36  ;;  %v1458_v33 = vld [vmem:[%s2685_s7 + $0x4e0] sm:$0xff]  ;;  %v1617_v34 = vsub.f32 %v1297_v26, %v1457_v27 }
 0x1bc   : > { %v1122_v21 = vadd.f32 %v1121_v11, %v963_v0  ;;  %v1918_v63 = vadd.f32 %v1917_v56, %v1759_v45  ;;  %v811_v0 = vsub.f32 %v491_v51, %v651_v52  ;;  %v1762_v8 = vand.u32 2147483647, %v1602_v54  ;;  %v1286_v11 = vld [vmem:[%s2682_s23 + $0x480] sm:$0xff]  ;;  %v655_v51 = vld [vmem:[%s2676_s13 + $0x4f0] sm:$0xff] }
 0x1bd   : > { %v1606_v23 = vsub.f32 %v1286_v11, %v1446_v12  ;;  %v1768_v54 = vand.u32 2147483647, %v1608_v38  ;;  %v1292_v56 = vld [vmem:[%s2682_s23 + $0x4b0] sm:$0xff]  ;;  %v1769_v59 = vand.u32 2147483647, %v1609_v43  ;;  %v815_v61 = vsub.f32 %v495_v50, %v655_v51  ;;  %v1459_v38 = vld [vmem:[%s2685_s7 + $0x4e8] sm:$0xff] }
 0x1be   : > { %v1123_v31 = vadd.f32 %v1122_v21, %v964_v10  ;;  %v1919_v9 = vadd.f32 %v1918_v63, %v1760_v55  ;;  %v971_v17 = vmul.f32 %v811_v0, %v811_v0  ;;  %v653_v21 = vld [vmem:[%s2676_s13 + $0x4e0] sm:$0xff]  ;;  %v1293_v63 = vld [vmem:[%s2682_s23 + $0x4b8] sm:$0xff]  ;;  %v1300_v43 = vld [vmem:[%s2682_s23 + $0x4f0] sm:$0xff] }
 0x1bf   : > { %v1766_v39 = vand.u32 2147483647, %v1606_v23  ;;  %v1453_v0 = vld [vmem:[%s2685_s7 + $0x4b8] sm:$0xff]  ;;  %v975_v13 = vmul.f32 %v815_v61, %v815_v61 }
 0x1c0   : > { %v1124_v41 = vadd.f32 %v1123_v31, %v965_v20  ;;  %v1920_v15 = vadd.f32 %v1919_v9, %v1761_v62  ;;  %v493_v20 = vld [vmem:[%s2669_s5 + $0x4e0] sm:$0xff]  ;;  %v974_v62 = vmul.f32 %v814_v46, %v814_v46  ;;  %v1613_v9 = vsub.f32 %v1293_v63, %v1453_v0 }
 0x1c1   : > { %v813_v31 = vsub.f32 %v493_v20, %v653_v21  ;;  %v1296_v20 = vld [vmem:[%s2682_s23 + $0x4d0] sm:$0xff]  ;;  %v1777_v46 = vand.u32 2147483647, %v1617_v34 }
 0x1c2   : > { %v1125_v48 = vadd.f32 %v1124_v41, %v966_v30  ;;  %v1921_v25 = vadd.f32 %v1920_v15, %v1762_v8  ;;  %v1290_v41 = vld [vmem:[%s2682_s23 + $0x4a0] sm:$0xff]  ;;  %v1455_v15 = vld [vmem:[%s2685_s7 + $0x4c8] sm:$0xff]  ;;  %v1456_v21 = vld [vmem:[%s2685_s7 + $0x4d0] sm:$0xff]  ;;  %v1773_v23 = vand.u32 2147483647, %v1613_v9 }
 0x1c3   : > { %v1610_v53 = vsub.f32 %v1290_v41, %v1450_v42  ;;  %v1454_v8 = vld [vmem:[%s2685_s7 + $0x4c0] sm:$0xff] }
 0x1c4   : > { %v1126_v58 = vadd.f32 %v1125_v48, %v967_v40  ;;  %v1922_v30 = vadd.f32 %v1921_v25, %v1763_v14  ;;  %v1291_v48 = vld [vmem:[%s2682_s23 + $0x4a8] sm:$0xff] }
 0x1c5   : > { %v1770_v5 = vand.u32 2147483647, %v1610_v53  ;;  %v1295_v14 = vld [vmem:[%s2682_s23 + $0x4c8] sm:$0xff] }
 0x1c6   : > { %v1127_v1 = vadd.f32 %v1126_v58, %v968_v47  ;;  %v1923_v40 = vadd.f32 %v1922_v30, %v1764_v24  ;;  %v973_v47 = vmul.f32 %v813_v31, %v813_v31  ;;  %v1611_v58 = vsub.f32 %v1291_v48, %v1451_v49  ;;  %v1301_v48 = vld [vmem:[%s2682_s23 + $0x4f8] sm:$0xff] }
 0x1c7   : > { %v1461_v49 = vld [vmem:[%s2685_s7 + $0x4f8] sm:$0xff] }
 0x1c8   : > { %v1128_v10 = vadd.f32 %v1127_v1, %v969_v57  ;;  %v1924_v45 = vadd.f32 %v1923_v40, %v1765_v29  ;;  %v1452_v57 = vld [vmem:[%s2685_s7 + $0x4b0] sm:$0xff]  ;;  %v496_v1 = vld [vmem:[%s2669_s5 + $0x4f8] sm:$0xff]  ;;  %v1616_v29 = vsub.f32 %v1296_v20, %v1456_v21 }
 0x1c9   : > { %v1612_v4 = vsub.f32 %v1292_v56, %v1452_v57  ;;  %v816_v12 = vsub.f32 %v496_v1, %v656_v2 }
 0x1ca   : > { %v1129_v22 = vadd.f32 %v1128_v10, %v970_v6  ;;  %v1925_v55 = vadd.f32 %v1924_v45, %v1766_v39  ;;  %v1771_v10 = vand.u32 2147483647, %v1611_v58  ;;  %v1776_v41 = vand.u32 2147483647, %v1616_v29 }
 0x1cb   : > { %v1772_v18 = vand.u32 2147483647, %v1612_v4  ;;  %v976_v25 = vmul.f32 %v816_v12, %v816_v12  ;;  %v2411_v4 = vmov 1966171168  }
 0x1cc   : > { %v1130_v37 = vadd.f32 %v1129_v22, %v971_v17  ;;  %v1926_v60 = vadd.f32 %v1925_v55, %v1767_v44  ;;  %v1614_v17 = vsub.f32 %v1294_v7, %v1454_v8  ;;  %v1615_v22 = vsub.f32 %v1295_v14, %v1455_v15  ;;  %v1460_v44 = vld [vmem:[%s2685_s7 + $0x4f0] sm:$0xff] }
 0x1cd   : > { %v1620_v51 = vsub.f32 %v1300_v43, %v1460_v44 }
 0x1ce   : > { %v1131_v52 = vadd.f32 %v1130_v37, %v972_v32  ;;  %v1927_v6 = vadd.f32 %v1926_v60, %v1768_v54  ;;  %v1774_v30 = vand.u32 2147483647, %v1614_v17  ;;  %v1298_v32 = vld [vmem:[%s2682_s23 + $0x4e0] sm:$0xff]  ;;  %v1775_v35 = vand.u32 2147483647, %v1615_v22  ;;  %v1299_v37 = vld [vmem:[%s2682_s23 + $0x4e8] sm:$0xff] }
 0x1cf   : > { %v1618_v40 = vsub.f32 %v1298_v32, %v1458_v33  ;;  %v1619_v45 = vsub.f32 %v1299_v37, %v1459_v38  ;;  %v1621_v54 = vsub.f32 %v1301_v48, %v1461_v49  ;;  %v1780_v58 = vand.u32 2147483647, %v1620_v51 }
 0x1d0   : > { %v1132_v3 = vadd.f32 %v1131_v52, %v973_v47  ;;  %v1928_v11 = vadd.f32 %v1927_v6, %v1769_v59  ;;  %v1953_v6 = vlaneseq }
 0x1d1   : > { %v1778_v52 = vand.u32 2147483647, %v1618_v40  ;;  %v1779_v55 = vand.u32 2147483647, %v1619_v45  ;;  %v1781_v60 = vand.u32 2147483647, %v1621_v54 }
 0x1d2   : > { %v1133_v16 = vadd.f32 %v1132_v3, %v974_v62  ;;  %v1929_v19 = vadd.f32 %v1928_v11, %v1770_v5  ;;  %v1951_v5 = vunpack.c.l.s4 %v2411_v4  ;;  %v1954_v11 = vshrl.u32 %v1953_v6, 7 }
 0x1d3   : > { %vm1967_vm0 = vcmp.lt.s32.totalorder %v1953_v6, 256 }
 0x1d4   : > { %v1930_v24 = vadd.f32 %v1929_v19, %v1771_v10  ;;  %v1134_v28 = vadd.f32 %v1133_v16, %v975_v13  ;;  %v1952_v10 = vunpack.c.0.s8 %v1951_v5 }
 0x1d6   : > { %v1931_v31 = vadd.f32 %v1930_v24, %v1772_v18  ;;  %v1135_v39 = vadd.f32 %v1134_v28, %v976_v25  ;;  %v1955_v15 = vsub.s32 %v1952_v10, %v1954_v11 }
 0x1d8   : > { %v1932_v36 = vadd.f32 %v1931_v31, %v1773_v23  ;;  %v1136_v50 = vrot.slane %v1135_v39, 4 }
 0x1da   : > { %v1933_v42 = vadd.f32 %v1932_v36, %v1774_v30  ;;  %v1137_v57 = vadd.f32 %v1136_v50, %v1135_v39 }
 0x1dc   : > { %v1934_v47 = vadd.f32 %v1933_v42, %v1775_v35  ;;  %v1138_v62 = vrot.slane %v1137_v57, 2 }
 0x1de   : > { %v1935_v53 = vadd.f32 %v1934_v47, %v1776_v41  ;;  %v1139_v1 = vadd.f32 %v1138_v62, %v1137_v57 }
 0x1e0   : > { %v1936_v56 = vadd.f32 %v1935_v53, %v1777_v46  ;;  %v1140_v7 = vrot.slane %v1139_v1, 1 }
 0x1e2   : > { %v1937_v59 = vadd.f32 %v1936_v56, %v1778_v52  ;;  %v1141_v12 = vadd.f32 %v1140_v7, %v1139_v1 }
 0x1e4   : > { %v1938_v61 = vadd.f32 %v1937_v59, %v1779_v55 }
 0x1e6   : > { %v1939_v63 = vadd.f32 %v1938_v61, %v1780_v58 }
 0x1e8   : > { %v1940_v0 = vadd.f32 %v1939_v63, %v1781_v60 }
 0x1ea   : > { %v1941_v2 = vrot.slane %v1940_v0, 4 }
 0x1ec   : > { %v1942_v3 = vadd.f32 %v1941_v2, %v1940_v0 }
 0x1ee   : > { %v1943_v8 = vrot.slane %v1942_v3, 2 }
 0x1f0   : > { %v1944_v9 = vadd.f32 %v1943_v8, %v1942_v3 }
 0x1f2   : > { %v1945_v13 = vrot.slane %v1944_v9, 1 }
 0x1f4   : > { %v1946_v14 = vadd.f32 %v1945_v13, %v1944_v9 }
 0x1f6   : > { %v1949_v16 = vcombine.low %v1141_v12, %v1946_v14 }
 0x1f8   : > { %v1956_v17 = vrot.slane %v1949_v16, %v1955_v15 }
 0x1fa   : > { %v1963_v18 = vrot.slane %v1956_v17, %v1955_v15 }
 0x1fc   : > { %1969 = vst.msk [vmem:[%s332_s20] sm:$0x3] %vm1967_vm0, %v1963_v18 }
 0x1fd   : > { %2342 = shalt.err (!%p2339_p5)
}
 0x1fe   : > { %s2343_s14 = scalar_lea.hbm %s3336_s30, 32  ;;  %s2347_s28 = scalar_lea.hbm %s3384_s4, 64 }
 0x1ff   : > { %p2344_p1 = scmp.ne.s32.totalorder %s3336_s30, %s2343_s14  ;;  %p2348_p12 = scmp.lt.u32.totalorder %s3336_s30, %s3384_s4 }
 0x200   : > { %p2349_p2 = scmp.lt.u32.totalorder %s2347_s28, %s2343_s14  ;;  %p2351_p13 = scmp.lt.u32.totalorder %s2343_s14, %s3336_s30 }
 0x201   : > { %p2345_p7 = pnand %p2344_p1, %p3407_p0 }
 0x202   : > { %p2350_p6 = por %p2349_p2, %p2348_p12 }
 0x203   : > { %p2346_p9 = pneg %p2345_p7 }
 0x204   : > { %p2352_p8 = por %p2351_p13, %p2350_p6 }
 0x206   : > { %p2353_p10 = pnand %p2352_p8, %p2346_p9 }
 0x208   : > { %2356 = shalt.err (!%p2353_p10)
}
 0x209   : > { %2153 = dma.vmem_to_hbm [thread:$0]  (%p3407_p0), %s3338_s1, 32, %s3336_s30, %s1971_s0  }
 0x20a PF: > { %s1997_s23 = sand.u32 1, %s2391_s15   ;;  %p3408_p11 = scmp.ne.s32.totalorder %s3396_s27, 0 }
 0x20b   : > { %p3409_p4 = scmp.ge.s32.totalorder %s2403_s18, 2  ;;  %s1998_s9 = scalar_lea.sflag [#allocation4], %s1997_s23 }
 0x20d   : > { %p2169_p3 = pnand %p3409_p4, %p3408_p11 }
 0x20f   : > { %2386 = dma.done.wait (!%p2169_p3), %s1998_s9, 32  }
 0x210   : > { %2388 = vsyncadd (!%p2169_p3), %s1998_s9, 4294967264  ;;  %s3410_s7 = sld [smem:[#allocation15_spill]]  ;;  %p23_p5 = scmp.ge.s32.totalorder %s2463_s21, 4  }
 0x211   : > { %s3411_s15 = smov %s2395_s16  ;;  %s3412_s16 = smov %s2399_s17 }
 0x212   : > { %s3414_s18 = smov %s2463_s21  ;;  %25 = sbr.rel (!%p23_p5) target bundleno = 12 (0xc), region = 118 }
 0x216   : > { %s3413_s17 = smov %s3410_s7 }
 0x219   :  { %2003 = vsyncpa [#allocation3], 1 }
 0x21a   :  { %2005 = vsyncpa [#allocation3 + $0x1], 1 }
 0x21b   :  { %2006 = vsyncpa [#allocation6], 1 }
 0x21c   :  { %2008 = vsyncpa [#allocation6 + $0x1], 1 }
 0x21d   :  { %2009 = vsyncpa [#allocation9], 1 }
 0x21e   :  { %2011 = vsyncpa [#allocation9 + $0x1], 1 }
 0x21f   :  { %2012 = vsyncpa [#allocation4], 1 }
 0x220   :  { %2014 = vsyncpa [#allocation4 + $0x1], 1 }

</bundles_post_ra>
